<compile_context>
chip_gen: v7x
topology: tpu7x:2x2x1
jax: 0.10.0
libtpu: 0.0.40
codegen_flags: <defaults>
</compile_context>

<pallas_src>
import functools

import jax
import jax.numpy as jnp
from jax.experimental import pallas as pl
from jax.experimental.pallas import tpu as pltpu

FEATURE_DIM = 2048     # ResNet-50 feature width (fc in_features)
NUM_CLASS = 10         # num_class for the linear head
CLASS_PAD = 128        # pad class dim to one full lane width


def head_kernel(feat_ref, w_ref, b_ref, out_ref, *, inv_hw):
    # feat_ref: (TB, HW, C) batch tile; w_ref: (C, CLASS_PAD); b_ref: (1, CLASS_PAD)
    feat = feat_ref[...]
    # AdaptiveAvgPool2d(1) + flatten(1) + nn.Linear fused:
    #   out = (sum_s feat[b,s,:]) @ W^T * (1/HW) + b
    acc = jnp.einsum('bsc,ck->bk', feat, w_ref[...],
                     preferred_element_type=jnp.float32)       # (TB, CLASS_PAD), f32 acc
    out_ref[...] = acc * inv_hw + b_ref[...]


def prepare_head_params(fc_w, fc_b):
    """Build the lane-padded fc parameters ONCE (hoisted out of the per-step path).

    fc_w: (num_class, 2048) PyTorch-layout Linear weight.  fc_b: (num_class,).
    Returns W^T padded to (2048, CLASS_PAD) and bias padded to (1, CLASS_PAD)."""
    num_class, c = fc_w.shape
    assert c == FEATURE_DIM and num_class <= CLASS_PAD
    w = jnp.zeros((c, CLASS_PAD), jnp.float32).at[:, :num_class].set(
        fc_w.T.astype(jnp.float32))
    b = jnp.zeros((1, CLASS_PAD), jnp.float32).at[:, :num_class].set(
        fc_b.astype(jnp.float32))
    return w, b


def net_head(feat_nhwc, w_pad, b_pad, *, num_class=NUM_CLASS, tb=64):
    """feat_nhwc: (B, H, W, 2048) backbone feature map (NHWC, no transpose needed).
    w_pad/b_pad: outputs of prepare_head_params. Returns (B, num_class) logits."""
    B, H, W, C = feat_nhwc.shape
    assert C == FEATURE_DIM
    HW = H * W

    # Free reshape (row-major contiguous): (B, H, W, C) -> (B, HW, C).
    feat = feat_nhwc.reshape(B, HW, C)

    # Batch tiling. Keep HW and C full-extent in the block (satisfies the (8,128)
    # constraint even when HW is not a multiple of 8, e.g. 7x7=49).
    if B <= tb:
        tb_eff, b_pad_rows = B, B           # single block, full-extent batch dim
    else:
        assert tb % 8 == 0, "batch tile must be a multiple of 8 when gridded"
        tb_eff = tb
        b_pad_rows = pl.cdiv(B, tb_eff) * tb_eff
        if b_pad_rows != B:
            feat = jnp.pad(feat, ((0, b_pad_rows - B), (0, 0), (0, 0)))
    grid = (b_pad_rows // tb_eff,)

    itemsize = feat.dtype.itemsize
    feat_blk_bytes = tb_eff * HW * C * itemsize
    w_bytes = C * CLASS_PAD * 4
    out_blk_bytes = tb_eff * CLASS_PAD * 4
    # Double-buffered feat + resident W/bias + double-buffered output + headroom.
    vmem_limit = 2 * feat_blk_bytes + w_bytes + 2 * out_blk_bytes + (4 << 20)
    vmem_limit = int(min(max(vmem_limit, 16 << 20), 48 << 20))

    cost = pl.CostEstimate(
        flops=2 * b_pad_rows * HW * C * CLASS_PAD,
        transcendentals=0,
        bytes_accessed=(b_pad_rows * HW * C * itemsize            # feature map read
                        + w_bytes + CLASS_PAD * 4                 # params
                        + b_pad_rows * CLASS_PAD * 4),            # logits write
    )

    out = pl.pallas_call(
        functools.partial(head_kernel, inv_hw=1.0 / HW),
        out_shape=jax.ShapeDtypeStruct((b_pad_rows, CLASS_PAD), jnp.float32),
        grid_spec=pltpu.PrefetchScalarGridSpec(
            num_scalar_prefetch=0,
            grid=grid,
            in_specs=[
                pl.BlockSpec((tb_eff, HW, C), lambda i: (i, 0, 0)),   # feat batch tile
                pl.BlockSpec((C, CLASS_PAD), lambda i: (0, 0)),       # W^T resident
                pl.BlockSpec((1, CLASS_PAD), lambda i: (0, 0)),       # bias resident
            ],
            out_specs=pl.BlockSpec((tb_eff, CLASS_PAD), lambda i: (i, 0)),
        ),
        compiler_params=pltpu.CompilerParams(
            dimension_semantics=("parallel",),   # shard batch tiles across v7x's 2 TCs
            vmem_limit_bytes=vmem_limit,
        ),
        cost_estimate=cost,
    )(feat, w_pad, b_pad)

    return out[:B, :num_class]


if __name__ == "__main__":
    key = jax.random.PRNGKey(0)
    k_feat, k_w, k_b = jax.random.split(key, 3)

    # Backbone feature map the SimCLR ResNet-50 f would emit for 32x32 inputs
    # (stride-1 stem, no maxpool), kept NHWC end-to-end: (B, 4, 4, 2048).
    B, H, W = 16, 4, 4
    feat_nhwc = jax.random.normal(k_feat, (B, H, W, FEATURE_DIM), jnp.float32)

    # Deterministic fc parameters (nn.Linear(2048, num_class, bias=True) shapes).
    bound = 1.0 / (FEATURE_DIM ** 0.5)
    fc_w = jax.random.uniform(k_w, (NUM_CLASS, FEATURE_DIM), jnp.float32, -bound, bound)
    fc_b = jax.random.uniform(k_b, (NUM_CLASS,), jnp.float32, -bound, bound)

    # Parameter padding hoisted out of the per-forward path.
    w_pad, b_pad = prepare_head_params(fc_w, fc_b)

    # tb=8 exercises a real 2-step batch grid at this small demo size
    # (production default tb=64).
    out = jax.block_until_ready(net_head(feat_nhwc, w_pad, b_pad, tb=8))

    # Pure-JAX reference of the same forward tail (avgpool + flatten + fc).
    pooled_ref = feat_nhwc.mean(axis=(1, 2))                  # (B, 2048)
    ref = pooled_ref @ fc_w.T + fc_b                          # nn.Linear
    assert out.shape == (B, NUM_CLASS)
    assert jnp.allclose(out, ref, atol=1e-4, rtol=1e-4), "mismatch vs reference"

    print("KERNEL_OK")
</pallas_src>

<mosaic_0001>
module attributes {stable_mosaic.version = 11 : i64} {
  func.func @head_kernel(%arg0: i32, %arg1: memref<8x16x2048xf32, #tpu.memory_space<vmem>>, %arg2: memref<2048x128xf32, #tpu.memory_space<vmem>>, %arg3: memref<1x128xf32, #tpu.memory_space<vmem>>, %arg4: memref<8x128xf32, #tpu.memory_space<vmem>>) attributes {dimension_semantics = [#tpu.dimension_semantics<parallel>], iteration_bounds = array<i64: 2>, scalar_prefetch = 0 : i64, scratch_operands = 0 : i64, tpu.core_type = #tpu.core_type<tc>, window_params = [{transform_indices = @transform_0, window_bounds = array<i64: 8, 16, 2048>}, {pipeline_mode = #tpu.pipeline_mode<synchronous>, transform_indices = @transform_1, window_bounds = array<i64: 2048, 128>}, {pipeline_mode = #tpu.pipeline_mode<synchronous>, transform_indices = @transform_2, window_bounds = array<i64: 1, 128>}, {transform_indices = @transform_3, window_bounds = array<i64: 8, 128>}]} {
    %c0 = arith.constant 0 : index
    %c0_0 = arith.constant 0 : index
    %c0_1 = arith.constant 0 : index
    %0 = vector.load %arg1[%c0, %c0_0, %c0_1] : memref<8x16x2048xf32, #tpu.memory_space<vmem>>, vector<8x16x2048xf32>
    %c0_2 = arith.constant 0 : index
    %c0_3 = arith.constant 0 : index
    %1 = vector.load %arg2[%c0_2, %c0_3] : memref<2048x128xf32, #tpu.memory_space<vmem>>, vector<2048x128xf32>
    "tpu.trace_start"() <{level = 10 : i32, message = "bsc,ck->bk"}> : () -> ()
    %cst = arith.constant dense<0.000000e+00> : vector<8x2048xf32>
    %2 = vector.multi_reduction <add>, %0, %cst [1] : vector<8x16x2048xf32> to vector<8x2048xf32>
    %cst_4 = arith.constant dense<0.000000e+00> : vector<8x128xf32>
    %3 = tpu.matmul %2, %1, %cst_4 {dimension_numbers = #tpu.dot_dimension_numbers<[1], [0], [0], [1], [0, 0, 1, 1], [], []>} : vector<8x2048xf32>, vector<2048x128xf32>, vector<8x128xf32> -> vector<8x128xf32>
    "tpu.trace_stop"() : () -> ()
    %cst_5 = arith.constant 6.250000e-02 : f32
    %4 = vector.broadcast %cst_5 : f32 to vector<8x128xf32>
    %5 = arith.mulf %3, %4 : vector<8x128xf32>
    %c0_6 = arith.constant 0 : index
    %c0_7 = arith.constant 0 : index
    %6 = vector.load %arg3[%c0_6, %c0_7] : memref<1x128xf32, #tpu.memory_space<vmem>>, vector<1x128xf32>
    %7 = vector.broadcast %6 : vector<1x128xf32> to vector<8x128xf32>
    %8 = arith.addf %5, %7 : vector<8x128xf32>
    %c0_8 = arith.constant 0 : index
    %c0_9 = arith.constant 0 : index
    %9 = vector.load %arg4[%c0_8, %c0_9] : memref<8x128xf32, #tpu.memory_space<vmem>>, vector<8x128xf32>
    tpu.vector_store %arg4[%c0_8, %c0_9], %8 {strides = array<i32>} : memref<8x128xf32, #tpu.memory_space<vmem>>, vector<8x128xf32>,
    return
  }
  func.func @transform_0(%arg0: i32) -> (i32, i32, i32) {
    %c0_i32 = arith.constant 0 : i32
    %c0_i32_0 = arith.constant 0 : i32
    %c0_i32_1 = arith.constant 0 : i32
    return %arg0, %c0_i32, %c0_i32_0 : i32, i32, i32
  }
  func.func @transform_1(%arg0: i32) -> (i32, i32) {
    %c0_i32 = arith.constant 0 : i32
    %c0_i32_0 = arith.constant 0 : i32
    %c0_i32_1 = arith.constant 0 : i32
    return %c0_i32, %c0_i32_0 : i32, i32
  }
  func.func @transform_2(%arg0: i32) -> (i32, i32) {
    %c0_i32 = arith.constant 0 : i32
    %c0_i32_0 = arith.constant 0 : i32
    %c0_i32_1 = arith.constant 0 : i32
    return %c0_i32, %c0_i32_0 : i32, i32
  }
  func.func @transform_3(%arg0: i32) -> (i32, i32) {
    %c0_i32 = arith.constant 0 : i32
    %c0_i32_0 = arith.constant 0 : i32
    return %arg0, %c0_i32 : i32, i32
  }
}

</mosaic_0001>

<bundles_post_ra>
// kernel: tpu_custom_call.1
= control target key start
LH: loop header
LB: loop body
LE: loop exit
PB: predicated region body
PF: predicated region fallthrough
CT: control target
= control target key end

     0   :  { %8 = vsyncpa [#allocation3], 0  ;;  %s4671_s0 = inlined_call_operand.hbm [shape: f32[16,16,2048], index: 0, kind: input, shape index: {}]   ;;  %s4672_s1 = inlined_call_operand.hbm [shape: f32[2048,128], index: 1, kind: input, shape index: {}]   ;;  %s4673_s2 = inlined_call_operand.hbm [shape: f32[1,128], index: 2, kind: input, shape index: {}]   ;;  %s4674_s3 = inlined_call_operand.hbm [shape: f32[16,128], index: 3, kind: output, shape index: {}]  }
   0x1   :  { %10 = vsyncpa [#allocation3 + $0x1], 0 }
   0x2   :  { %11 = vsyncpa [#allocation6], 0 }
   0x3   :  { %12 = vsyncpa [#allocation4], 0 }
   0x4   :  { %14 = vsyncpa [#allocation4 + $0x1], 0  ;;  %s3374_s12 = smov 0   ;;  %s3376_s13 = smov 0  }
   0x5   :  { %s3378_s14 = smov 0   ;;  %s3380_s15 = smov 0  }
   0x6 LB: > { %s3395_s16 = sadd.s32 4294967295, %s3345_s15   ;;  %s2562_s17 = sadd.s32 4294967294, %s3345_s15   ;;  %s3345_s15 = sphi %s3380_s15, %s4786_s15   ;;  %s3341_s14 = sphi %s3378_s14, %s4785_s14   ;;  %s3337_s13 = sphi %s3376_s13, %s4784_s13   ;;  %s3333_s12 = sphi %s3374_s12, %s4783_s12  }
   0x7   : > { %p40_p0 = scmp.ne.s32.totalorder %s3337_s13, %s3333_s12  ;;  %p4675_p1 = scmp.eq.s32.totalorder %s3395_s16, 0 }
   0x8   : > { %p112_p3 = scmp.eq.s32.totalorder %s2562_s17, 1  ;;  %p2563_p5 = scmp.ge.s32.totalorder %s3345_s15, 1 }
   0x9   : > { %p3404_p4 = por %p4675_p1, %p40_p0  ;;  %p119_p7 = scmp.lt.s32.totalorder %s3345_s15, 3 }
   0xa   : > { %p3409_p6 = por %p112_p3, %p40_p0  ;;  %s3347_s21 = smov [#allocation5]  }
   0xb   : > { %s4692_s18 = scalar_select %p3404_p4, 1, 0 }
   0xc   : > { %s4693_s19 = scalar_select %p3409_p6, 1, 0 }
   0xd   : > { %p3414_p8 = pnand %p2563_p5, %p119_p7  ;;  %s131_s22 = sshll.u32 %s3347_s21, 4  ;;  %s3418_s22 = int_to_ptr.vmem [resolvable:$true] %s131_s22 }
   0xe   : > { %s3348_s24 = smov [#allocation7]   ;;  %s3189_s28 = scalar_lea.hbm %s4672_s1, 32768 }
   0xf   : > { %p3131_p9 = pneg %p3414_p8  ;;  %s145_s25 = sshll.u32 %s3348_s24, 4  ;;  %s3429_s25 = int_to_ptr.vmem [resolvable:$true] %s145_s25 }
  0x10   : > { %p3190_p12 = scmp.ne.s32.totalorder %s4672_s1, %s3189_s28  ;;  %p3196_p5 = scmp.lt.u32.totalorder %s3189_s28, %s4672_s1 }
  0x11   : > { %p3425_p11 = pnand %p3131_p9, %p4675_p1 }
  0x13   : > { %p3191_p13 = pneg %p3425_p11 }
  0x15   : > { %p3192_p0 = pnand %p3191_p13, %p3190_p12 }
  0x17   : > { %p3193_p3 = pneg %p3192_p0 }
  0x19   : > { %p3198_p7 = pnand %p3196_p5, %p3193_p3 }
  0x1b   : > { %3201 = shalt.err (!%p3198_p7)
}
  0x1c   : > { %s3202_s6 = scalar_lea.vmem %s3418_s22, 32768  ;;  %p3210_p2 = scmp.lt.s32.totalorder %s3418_s22, %s3418_s22 }
  0x1d   : > { %p3203_p9 = scmp.ne.s32.totalorder %s3418_s22, %s3202_s6  ;;  %p3211_p12 = scmp.lt.s32.totalorder %s3202_s6, %s3202_s6 }
  0x1f   : > { %p3205_p10 = pnand %p3203_p9, %p3191_p13  ;;  %p3212_p0 = por %p3211_p12, %p3210_p2 }
  0x21   : > { %p3206_p1 = pneg %p3205_p10 }
  0x23   : > { %p3213_p6 = pnand %p3212_p0, %p3206_p1 }
  0x25   : > { %3216 = shalt.err (!%p3213_p6)
}
  0x26   : > { %s3349_s7 = smov 128   ;;  %s3350_s8 = smov 8  }
  0x27   : > { %3134 = dma.hbm_to_vmem [thread:$0]  (!%p3425_p11), %s4672_s1, 32768, %s3418_s22, [#allocation6], %s3349_s7, %s3349_s7, %s3350_s8  }
  0x28   : > { %s3217_s21 = scalar_lea.hbm %s4673_s2, 16 }
  0x29   : > { %p3218_p1 = scmp.ne.s32.totalorder %s4673_s2, %s3217_s21  ;;  %p3224_p10 = scmp.lt.u32.totalorder %s3217_s21, %s4673_s2 }
  0x2b   : > { %p3220_p2 = pnand %p3218_p1, %p3191_p13 }
  0x2d   : > { %p3221_p6 = pneg %p3220_p2 }
  0x2f   : > { %p3226_p3 = pnand %p3224_p10, %p3221_p6 }
  0x31   : > { %3229 = shalt.err (!%p3226_p3)
}
  0x32   : > { %s3230_s22 = scalar_lea.vmem %s3429_s25, 16  ;;  %s3237_s29 = scalar_lea.vmem %s3429_s25, 32 }
  0x33   : > { %p3231_p5 = scmp.ne.s32.totalorder %s3429_s25, %s3230_s22  ;;  %p3238_p12 = scmp.lt.s32.totalorder %s3429_s25, %s3429_s25 }
  0x34   : > { %p3239_p0 = scmp.lt.s32.totalorder %s3237_s29, %s3230_s22 }
  0x35   : > { %p3233_p7 = pnand %p3231_p5, %p3191_p13 }
  0x36   : > { %p3240_p1 = por %p3239_p0, %p3238_p12 }
  0x37   : > { %p3234_p9 = pneg %p3233_p7 }
  0x39   : > { %p3241_p2 = pnand %p3240_p1, %p3234_p9 }
  0x3b   : > { %3244 = shalt.err (!%p3241_p2)
}
  0x3c   : > { %3137 = dma.hbm_to_vmem [thread:$0]  (!%p3425_p11), %s4673_s2, 16, %s3429_s25, [#allocation6]  }
  0x3d   : > { %s3487_s5 = sadd.s32 1, %s3345_s15   ;;  %s27_s23 = sadd.s32 1, %s3341_s14 }
  0x3e   : > { %s24_s6 = ssub.s32 %s3345_s15, %s3487_s5  ;;  %p34_p13 = scmp.ne.s32.totalorder %s3341_s14, %s3337_s13 }
  0x3f   : > { %p25_p6 = scmp.eq.s32.totalorder %s24_s6, 0  ;;  %p35_p10 = scmp.eq.s32.totalorder %s3345_s15, 0 }
  0x40   : > { %p4696_p3 = scmp.eq.s32.totalorder %s3395_s16, 1  ;;  %p3148_p7 = scmp.lt.s32.totalorder %s3345_s15, 2 }
  0x41   : > { %s3503_s9 = scalar_select %p25_p6, %s3341_s14, %s27_s23  }
  0x42   : > { %p3497_p5 = por %p4696_p3, %p34_p13  ;;  %p36_p9 = por %p35_p10, %p34_p13 }
  0x43   : > { %s156_s10 = sand.u32 1, %s3341_s14   ;;  %s2582_s25 = sshll.u32 %s3345_s15, 15 }
  0x44   : > { %s4697_s8 = scalar_select %p3497_p5, 1, 0 }
  0x45   : > { %s2567_s11 = sshll.u32 %s156_s10, 11  ;;  %s3510_s24 = scalar_lea.hbm %s4671_s0, %s2582_s25 }
  0x46   : > { %s160_s26 = scalar_lea.vmem [#allocation2], %s2567_s11  ;;  %p3514_p11 = pnand %p3148_p7, %p36_p9 }
  0x47   : > { %s168_s27 = sshll.u32 %s160_s26, 4  ;;  %s3518_s22 = scalar_lea.sflag [#allocation3], %s156_s10  ;;  %s3512_s27 = int_to_ptr.vmem [resolvable:$true] %s168_s27 }
  0x48   : > { %s3245_s29 = scalar_lea.hbm %s3510_s24, 32768  ;;  %p3247_p0 = pneg %p3514_p11 }
  0x49   : > { %p3246_p12 = scmp.ne.s32.totalorder %s3510_s24, %s3245_s29  ;;  %s3250_s23 = scalar_lea.hbm %s4671_s0, 65536 }
  0x4a   : > { %p3251_p13 = scmp.lt.u32.totalorder %s3510_s24, %s4671_s0  ;;  %p3252_p6 = scmp.lt.u32.totalorder %s3250_s23, %s3245_s29 }
  0x4b   : > { %p3248_p1 = pnand %p3247_p0, %p3246_p12  ;;  %p3254_p3 = scmp.lt.u32.totalorder %s3245_s29, %s3510_s24 }
  0x4c   : > { %p3253_p10 = por %p3252_p6, %p3251_p13 }
  0x4d   : > { %p3249_p2 = pneg %p3248_p1 }
  0x4e   : > { %p3255_p7 = por %p3254_p3, %p3253_p10 }
  0x50   : > { %p3256_p9 = pnand %p3255_p7, %p3249_p2 }
  0x52   : > { %3259 = shalt.err (!%p3256_p9)
}
  0x53   : > { %s3260_s10 = scalar_lea.vmem %s3512_s27, 32768  ;;  %s3351_s25 = smov [#allocation2]  }
  0x54   : > { %p3261_p12 = scmp.ne.s32.totalorder %s3512_s27, %s3260_s10  ;;  %s3265_s17 = sshll.u32 %s3351_s25, 4  ;;  %s3266_s17 = int_to_ptr.vmem [resolvable:$false] %s3265_s17 }
  0x55   : > { %s3267_s21 = scalar_lea.vmem %s3266_s17, 65536  ;;  %p3268_p4 = scmp.lt.s32.totalorder %s3512_s27, %s3266_s17 }
  0x56   : > { %p3263_p1 = pnand %p3261_p12, %p3247_p0  ;;  %p3269_p13 = scmp.lt.s32.totalorder %s3267_s21, %s3260_s10 }
  0x58   : > { %p3264_p5 = pneg %p3263_p1  ;;  %p3270_p6 = por %p3269_p13, %p3268_p4 }
  0x5a   : > { %p3271_p10 = pnand %p3270_p6, %p3264_p5 }
  0x5c   : > { %3274 = shalt.err (!%p3271_p10)
}
  0x5d   : > { %s3352_s26 = smov 2048   ;;  %180 = sbr.rel (%p3414_p8) target bundleno = 674 (0x2a2), region = 32 }
  0x5e   : > { %3141 = dma.hbm_to_vmem [thread:$0]  (!%p3514_p11), %s3510_s24, 32768, %s3512_s27, %s3518_s22, %s3352_s26, %s3352_s26, %s3349_s7  }
  0x64   : > { %s3550_s29 = sand.u32 1, %s3337_s13   ;;  %p4699_p4 = scmp.ne.s32.totalorder %s4692_s18, 0 }
  0x65   : > { %s2572_s30 = sshll.u32 %s3550_s29, 11  ;;  %s183_s4 = scalar_lea.sflag [#allocation3], %s3550_s29 }
  0x66   : > { %s3554_s23 = scalar_lea.vmem [#allocation2], %s2572_s30 }
  0x67   : > { %3320 = dma.done.wait (%p4699_p4), %s183_s4, 32768  }
  0x68   : > { %3322 = vsyncadd (%p4699_p4), %s183_s4, 4294934528  ;;  %p4700_p5 = scmp.eq.s32.totalorder %s3395_s16, 0 }
  0x6a   : > { %3324 = dma.done.wait (%p4700_p5), [#allocation6], 32784   ;;  %p4701_p8 = pmov %p4700_p5 }
  0x6b   : > { %v490_v0 = vld [vmem:[#allocation5 + $0x80] sm:$0xff]  ;;  %v491_v1 = vld [vmem:[#allocation5 + $0x88] sm:$0xff]  ;;  %v492_v11 = vld [vmem:[#allocation5 + $0x90] sm:$0xff]  ;;  %vm1754_vm0 = vcmask 1041409   ;;  %vm1756_vm1 = vcmask 1042434   ;;  %vm1758_vm2 = vcmask 1043459  }
  0x6c   : > { %3326 = vsyncadd (%p4701_p8), [#allocation6], 4294934512  ;;  %v522_v2 = vld [vmem:[#allocation5 + $0x180] sm:$0xff]  ;;  %v2863_v3 = vpack.c.bf16 %v491_v1, %v490_v0  ;;  %v523_v4 = vld [vmem:[#allocation5 + $0x188] sm:$0xff]  ;;  %vm1760_vm3 = vcmask 1044484   ;;  %vm1762_vm4 = vcmask 1045509  }
  0x6d   : > { %v474_v5 = vld [vmem:[#allocation5] sm:$0xff]  ;;  %v475_v6 = vld [vmem:[#allocation5 + $0x8] sm:$0xff]  ;;  %v2895_v7 = vpack.c.bf16 %v523_v4, %v522_v2  ;;  %v493_v13 = vld [vmem:[#allocation5 + $0x98] sm:$0xff]  ;;  %vm1764_vm5 = vcmask 1046534   ;;  %vm1766_vm6 = vcmask 1047559   ;;  %s2575_s18 = sshll.u32 %s3550_s29, 3 }
  0x6e   : > { %v2865_v8 = vpack.c.bf16 %v475_v6, %v474_v5  ;;  %v506_v9 = vld [vmem:[#allocation5 + $0x100] sm:$0xff]  ;;  %v507_v10 = vld [vmem:[#allocation5 + $0x108] sm:$0xff]  ;;  %2864 = vmatprep.subr.bf16.mxu0 %v2863_v3  ;;  %v524_v14 = vld [vmem:[#allocation5 + $0x190] sm:$0xff]  ;;  %v2867_v16 = vpack.c.bf16 %v493_v13, %v492_v11  ;;  %s2578_s20 = sshll.u32 %s3395_s16, 7  ;;  %s216_s7 = scalar_lea.vmem [#allocation8], %s2575_s18 }
  0x6f   : > { %v2897_v12 = vpack.c.bf16 %v507_v10, %v506_v9  ;;  %v525_v15 = vld [vmem:[#allocation5 + $0x198] sm:$0xff]  ;;  %2896 = vmatprep.subr.bf16.mxu1 %v2895_v7  ;;  %v476_v18 = vld [vmem:[#allocation5 + $0x10] sm:$0xff]  ;;  %v494_v23 = vld [vmem:[#allocation5 + $0xa0] sm:$0xff]  ;;  %s2473_s24 = sshll.u32 %s216_s7, 4  ;;  %s4627_s22 = scalar_lea.hbm %s4674_s3, %s2578_s20  ;;  %s4629_s24 = int_to_ptr.vmem [resolvable:$true] %s2473_s24 }
  0x70   : > { %2866 = vmatpush3.bf16.msra.mxu0 %v2865_v8  ;;  %v2899_v17 = vpack.c.bf16 %v525_v15, %v524_v14  ;;  %v477_v19 = vld [vmem:[#allocation5 + $0x18] sm:$0xff]  ;;  %v508_v20 = vld [vmem:[#allocation5 + $0x110] sm:$0xff]  ;;  %v495_v24 = vld [vmem:[#allocation5 + $0xa8] sm:$0xff]  ;;  %s2460_s6 = scalar_lea.sflag [#allocation4], %s3550_s29  ;;  %s3275_s11 = scalar_lea.vmem %s4629_s24, 128 }
  0x71   : > { %2898 = vmatpush3.bf16.msra.mxu1 %v2897_v12  ;;  %v2869_v21 = vpack.c.bf16 %v477_v19, %v476_v18  ;;  %v509_v22 = vld [vmem:[#allocation5 + $0x118] sm:$0xff]  ;;  %2868 = vmatprep.subr.bf16.mxu0 %v2867_v16  ;;  %v2871_v26 = vpack.c.bf16 %v495_v24, %v494_v23  ;;  %v526_v27 = vld [vmem:[#allocation5 + $0x1a0] sm:$0xff]  ;;  %v527_v28 = vld [vmem:[#allocation5 + $0x1a8] sm:$0xff]  ;;  %p3276_p11 = scmp.ne.s32.totalorder %s4629_s24, %s3275_s11  ;;  %p4780_p0 = scmp.ne.s32.totalorder %s4697_s8, 0 }
  0x72   : > { %2900 = vmatprep.subr.bf16.mxu1 %v2899_v17  ;;  %v2901_v25 = vpack.c.bf16 %v509_v22, %v508_v20  ;;  %v478_v29 = vld [vmem:[#allocation5 + $0x20] sm:$0xff]  ;;  %v2903_v30 = vpack.c.bf16 %v527_v28, %v526_v27  ;;  %v479_v31 = vld [vmem:[#allocation5 + $0x28] sm:$0xff]  ;;  %v496_v35 = vld [vmem:[#allocation5 + $0xb0] sm:$0xff]  ;;  %s3353_s16 = smov [#allocation8]  }
  0x73   : > { %v510_v32 = vld [vmem:[#allocation5 + $0x120] sm:$0xff]  ;;  %v511_v33 = vld [vmem:[#allocation5 + $0x128] sm:$0xff]  ;;  %v2873_v34 = vpack.c.bf16 %v479_v31, %v478_v29  ;;  %v497_v36 = vld [vmem:[#allocation5 + $0xb8] sm:$0xff]  ;;  %p3277_p2 = pnand %p3276_p11, %p4780_p0  ;;  %s3279_s10 = sshll.u32 %s3353_s16, 4  ;;  %s3280_s10 = int_to_ptr.vmem [resolvable:$false] %s3279_s10 }
  0x74   : > { %2870 = vmatpush3.bf16.msra.mxu0 %v2869_v21  ;;  %v528_v37 = vld [vmem:[#allocation5 + $0x1b0] sm:$0xff]  ;;  %v2905_v38 = vpack.c.bf16 %v511_v33, %v510_v32  ;;  %v2875_v39 = vpack.c.bf16 %v497_v36, %v496_v35  ;;  %v529_v40 = vld [vmem:[#allocation5 + $0x1b8] sm:$0xff]  ;;  %v498_v46 = vld [vmem:[#allocation5 + $0xc0] sm:$0xff]  ;;  %s3281_s25 = scalar_lea.vmem %s3280_s10, 256  ;;  %p3282_p7 = scmp.lt.s32.totalorder %s4629_s24, %s3280_s10 }
  0x75   : > { %2902 = vmatpush3.bf16.msra.mxu1 %v2901_v25  ;;  %2872 = vmatprep.subr.bf16.mxu0 %v2871_v26  ;;  %v480_v41 = vld [vmem:[#allocation5 + $0x30] sm:$0xff]  ;;  %v481_v42 = vld [vmem:[#allocation5 + $0x38] sm:$0xff]  ;;  %v2907_v43 = vpack.c.bf16 %v529_v40, %v528_v37  ;;  %v499_v47 = vld [vmem:[#allocation5 + $0xc8] sm:$0xff]  ;;  %p3278_p3 = pneg %p3277_p2  ;;  %p3283_p9 = scmp.lt.s32.totalorder %s3281_s25, %s3275_s11 }
  0x76   : > { %2904 = vmatprep.subr.bf16.mxu1 %v2903_v30  ;;  %v512_v44 = vld [vmem:[#allocation5 + $0x130] sm:$0xff]  ;;  %v513_v45 = vld [vmem:[#allocation5 + $0x138] sm:$0xff]  ;;  %v530_v48 = vld [vmem:[#allocation5 + $0x1c0] sm:$0xff]  ;;  %v2877_v50 = vpack.c.bf16 %v481_v42, %v480_v41  ;;  %v2879_v53 = vpack.c.bf16 %v499_v47, %v498_v46 }
  0x77   : > { %v531_v49 = vld [vmem:[#allocation5 + $0x1c8] sm:$0xff]  ;;  %v482_v51 = vld [vmem:[#allocation5 + $0x40] sm:$0xff]  ;;  %v2909_v52 = vpack.c.bf16 %v513_v45, %v512_v44  ;;  %v500_v58 = vld [vmem:[#allocation5 + $0xd0] sm:$0xff]  ;;  %p3284_p12 = por %p3283_p9, %p3282_p7 }
  0x78   : > { %2874 = vmatpush3.bf16.msra.mxu0 %v2873_v34  ;;  %v483_v54 = vld [vmem:[#allocation5 + $0x48] sm:$0xff]  ;;  %v514_v55 = vld [vmem:[#allocation5 + $0x140] sm:$0xff]  ;;  %v2911_v57 = vpack.c.bf16 %v531_v49, %v530_v48  ;;  %v501_v59 = vld [vmem:[#allocation5 + $0xd8] sm:$0xff] }
  0x79   : > { %2906 = vmatpush3.bf16.msra.mxu1 %v2905_v38  ;;  %2876 = vmatprep.subr.bf16.mxu0 %v2875_v39  ;;  %v515_v56 = vld [vmem:[#allocation5 + $0x148] sm:$0xff]  ;;  %v532_v60 = vld [vmem:[#allocation5 + $0x1d0] sm:$0xff]  ;;  %v533_v61 = vld [vmem:[#allocation5 + $0x1d8] sm:$0xff]  ;;  %v2881_v0 = vpack.c.bf16 %v483_v54, %v482_v51  ;;  %v2883_v5 = vpack.c.bf16 %v501_v59, %v500_v58  ;;  %p3285_p1 = pnand %p3284_p12, %p3278_p3 }
  0x7a   : > { %2908 = vmatprep.subr.bf16.mxu1 %v2907_v43  ;;  %v484_v62 = vld [vmem:[#allocation5 + $0x50] sm:$0xff]  ;;  %v485_v63 = vld [vmem:[#allocation5 + $0x58] sm:$0xff]  ;;  %v502_v3 = vld [vmem:[#allocation5 + $0xe0] sm:$0xff]  ;;  %v2913_v4 = vpack.c.bf16 %v515_v56, %v514_v55  ;;  %v2915_v9 = vpack.c.bf16 %v533_v61, %v532_v60 }
  0x7b   : > { %v516_v1 = vld [vmem:[#allocation5 + $0x150] sm:$0xff]  ;;  %v517_v2 = vld [vmem:[#allocation5 + $0x158] sm:$0xff]  ;;  %v503_v6 = vld [vmem:[#allocation5 + $0xe8] sm:$0xff]  ;;  %v2885_v18 = vpack.c.bf16 %v485_v63, %v484_v62 }
  0x7c   : > { %2878 = vmatpush3.bf16.msra.mxu0 %v2877_v50  ;;  %v534_v7 = vld [vmem:[#allocation5 + $0x1e0] sm:$0xff]  ;;  %v535_v8 = vld [vmem:[#allocation5 + $0x1e8] sm:$0xff]  ;;  %v3570_v14 = vld [vmem:[#allocation5 + $0xf0] sm:$0xff]  ;;  %v2917_v22 = vpack.c.bf16 %v517_v2, %v516_v1  ;;  %v2887_v23 = vpack.c.bf16 %v503_v6, %v502_v3 }
  0x7d   : > { %2910 = vmatpush3.bf16.msra.mxu1 %v2909_v52  ;;  %2880 = vmatprep.subr.bf16.mxu0 %v2879_v53  ;;  %v3564_v10 = vld [vmem:[#allocation5 + $0x60] sm:$0xff]  ;;  %v487_v11 = vld [vmem:[#allocation5 + $0x68] sm:$0xff]  ;;  %v3572_v15 = vld [vmem:[#allocation5 + $0xf8] sm:$0xff]  ;;  %v2919_v27 = vpack.c.bf16 %v535_v8, %v534_v7 }
  0x7e   : > { %2912 = vmatprep.subr.bf16.mxu1 %v2911_v57  ;;  %v3566_v12 = vld [vmem:[#allocation5 + $0x160] sm:$0xff]  ;;  %v3568_v13 = vld [vmem:[#allocation5 + $0x168] sm:$0xff]  ;;  %v3574_v16 = vld [vmem:[#allocation5 + $0x1f0] sm:$0xff]  ;;  %v2889_v32 = vpack.c.bf16 %v487_v11, %v3564_v10  ;;  %v2891_v34 = vpack.c.bf16 %v3572_v15, %v3570_v14 }
  0x7f   : > { %v3576_v17 = vld [vmem:[#allocation5 + $0x1f8] sm:$0xff]  ;;  %v3578_v19 = vld [vmem:[#allocation5 + $0x70] sm:$0xff]  ;;  %v219_v25 = vld [vmem:[%s3554_s23 + $0x8] sm:$0xff]  ;;  %v2921_v33 = vpack.c.bf16 %v3568_v13, %v3566_v12 }
  0x80   : > { %2882 = vmatpush3.bf16.msra.mxu0 %v2881_v0  ;;  %v3580_v20 = vld [vmem:[#allocation5 + $0x78] sm:$0xff]  ;;  %v3582_v21 = vld [vmem:[#allocation5 + $0x170] sm:$0xff]  ;;  %v235_v26 = vld [vmem:[%s3554_s23 + $0x88] sm:$0xff]  ;;  %v2923_v39 = vpack.c.bf16 %v3576_v17, %v3574_v16 }
  0x81   : > { %2914 = vmatpush3.bf16.msra.mxu1 %v2913_v4  ;;  %2884 = vmatprep.subr.bf16.mxu0 %v2883_v5  ;;  %v3584_v24 = vld [vmem:[#allocation5 + $0x178] sm:$0xff]  ;;  %v251_v28 = vld [vmem:[%s3554_s23 + $0x108] sm:$0xff]  ;;  %v737_v31 = vadd.f32 %v235_v26, %v219_v25  ;;  %v2893_v46 = vpack.c.bf16 %v3580_v20, %v3578_v19 }
  0x82   : > { %2916 = vmatprep.subr.bf16.mxu1 %v2915_v9  ;;  %v267_v29 = vld [vmem:[%s3554_s23 + $0x188] sm:$0xff]  ;;  %v2925_v47 = vpack.c.bf16 %v3584_v24, %v3582_v21  ;;  %v237_v24 = vld [vmem:[%s3554_s23 + $0x98] sm:$0xff] }
  0x83   : > { %v283_v30 = vld [vmem:[%s3554_s23 + $0x208] sm:$0xff]  ;;  %v849_v38 = vadd.f32 %v267_v29, %v251_v28  ;;  %v738_v43 = vrot.slane %v737_v31, 4 }
  0x84   : > { %v299_v35 = vld [vmem:[%s3554_s23 + $0x288] sm:$0xff]  ;;  %2886 = vmatpush3.bf16.msra.mxu0 %v2885_v18 }
  0x85   : > { %v315_v36 = vld [vmem:[%s3554_s23 + $0x308] sm:$0xff]  ;;  %v961_v44 = vadd.f32 %v299_v35, %v283_v30  ;;  %2918 = vmatpush3.bf16.msra.mxu1 %v2917_v22  ;;  %2888 = vmatprep.subr.bf16.mxu0 %v2887_v23  ;;  %v850_v51 = vrot.slane %v849_v38, 4  ;;  %v739_v55 = vadd.f32 %v738_v43, %v737_v31  ;;  %v221_v23 = vld [vmem:[%s3554_s23 + $0x18] sm:$0xff] }
  0x86   : > { %v331_v37 = vld [vmem:[%s3554_s23 + $0x388] sm:$0xff]  ;;  %2920 = vmatprep.subr.bf16.mxu1 %v2919_v27 }
  0x87   : > { %v347_v40 = vld [vmem:[%s3554_s23 + $0x408] sm:$0xff]  ;;  %v1073_v45 = vadd.f32 %v331_v37, %v315_v36  ;;  %v962_v56 = vrot.slane %v961_v44, 4  ;;  %v851_v59 = vadd.f32 %v850_v51, %v849_v38  ;;  %v740_v63 = vrot.slane %v739_v55, 2  ;;  %v285_v38 = vld [vmem:[%s3554_s23 + $0x218] sm:$0xff] }
  0x88   : > { %v363_v41 = vld [vmem:[%s3554_s23 + $0x488] sm:$0xff]  ;;  %2890 = vmatpush3.bf16.msra.mxu0 %v2889_v32  ;;  %v381_v51 = vld [vmem:[%s3554_s23 + $0x518] sm:$0xff] }
  0x89   : > { %v379_v42 = vld [vmem:[%s3554_s23 + $0x508] sm:$0xff]  ;;  %v1185_v52 = vadd.f32 %v363_v41, %v347_v40  ;;  %v1074_v57 = vrot.slane %v1073_v45, 4  ;;  %v963_v0 = vadd.f32 %v962_v56, %v961_v44  ;;  %2922 = vmatpush3.bf16.msra.mxu1 %v2921_v33  ;;  %2892 = vmatprep.subr.bf16.mxu0 %v2891_v34  ;;  %v852_v3 = vrot.slane %v851_v59, 2  ;;  %v253_v33 = vld [vmem:[%s3554_s23 + $0x118] sm:$0xff] }
  0x8a   : > { %v395_v48 = vld [vmem:[%s3554_s23 + $0x588] sm:$0xff]  ;;  %2924 = vmatprep.subr.bf16.mxu1 %v2923_v39  ;;  %v741_v7 = vadd.f32 %v740_v63, %v739_v55  ;;  %v269_v34 = vld [vmem:[%s3554_s23 + $0x198] sm:$0xff]  ;;  %v751_v40 = vadd.f32 %v237_v24, %v221_v23 }
  0x8b   : > { %v411_v49 = vld [vmem:[%s3554_s23 + $0x608] sm:$0xff]  ;;  %v1297_v58 = vadd.f32 %v395_v48, %v379_v42  ;;  %v1186_v60 = vrot.slane %v1185_v52, 4  ;;  %v1075_v1 = vadd.f32 %v1074_v57, %v1073_v45  ;;  %v964_v8 = vrot.slane %v963_v0, 2  ;;  %v301_v39 = vld [vmem:[%s3554_s23 + $0x298] sm:$0xff] }
  0x8c   : > { %v427_v50 = vld [vmem:[%s3554_s23 + $0x688] sm:$0xff]  ;;  %v853_v11 = vadd.f32 %v852_v3, %v851_v59  ;;  %2894 = vmatpush3.bf16.msra.mxu0 %v2893_v46  ;;  %v742_v15 = vrot.slane %v741_v7, 1  ;;  %v317_v45 = vld [vmem:[%s3554_s23 + $0x318] sm:$0xff] }
  0x8d   : > { %v443_v53 = vld [vmem:[%s3554_s23 + $0x708] sm:$0xff]  ;;  %v1409_v61 = vadd.f32 %v427_v50, %v411_v49  ;;  %v1298_v2 = vrot.slane %v1297_v58, 4  ;;  %v1187_v4 = vadd.f32 %v1186_v60, %v1185_v52  ;;  %v1076_v9 = vrot.slane %v1075_v1, 2  ;;  %2926 = vmatpush3.bf16.msra.mxu1 %v2925_v47  ;;  %v333_v46 = vld [vmem:[%s3554_s23 + $0x398] sm:$0xff] }
  0x8e   : > { %v459_v54 = vld [vmem:[%s3554_s23 + $0x788] sm:$0xff]  ;;  %v965_v16 = vadd.f32 %v964_v8, %v963_v0  ;;  %v854_v19 = vrot.slane %v853_v11, 1  ;;  %v743_v25 = vadd.f32 %v742_v15, %v741_v7  ;;  %v349_v47 = vld [vmem:[%s3554_s23 + $0x418] sm:$0xff] }
  0x8f   : > { %v1521_v62 = vadd.f32 %v459_v54, %v443_v53  ;;  %v1410_v5 = vrot.slane %v1409_v61, 4  ;;  %v1299_v10 = vadd.f32 %v1298_v2, %v1297_v58  ;;  %v1188_v12 = vrot.slane %v1187_v4, 2  ;;  %v365_v50 = vld [vmem:[%s3554_s23 + $0x498] sm:$0xff] }
  0x90   : > { %v1077_v17 = vadd.f32 %v1076_v9, %v1075_v1  ;;  %v966_v26 = vrot.slane %v965_v16, 1  ;;  %v855_v29 = vadd.f32 %v854_v19, %v853_v11  ;;  %v397_v52 = vld [vmem:[%s3554_s23 + $0x598] sm:$0xff]  ;;  %v752_v53 = vrot.slane %v751_v40, 4 }
  0x91   : > { %v1522_v6 = vrot.slane %v1521_v62, 4  ;;  %v1411_v13 = vadd.f32 %v1410_v5, %v1409_v61  ;;  %v1300_v18 = vrot.slane %v1299_v10, 2  ;;  %v1189_v20 = vadd.f32 %v1188_v12, %v1187_v4  ;;  %v413_v0 = vld [vmem:[%s3554_s23 + $0x618] sm:$0xff] }
  0x92   : > { %v1078_v27 = vrot.slane %v1077_v17, 1  ;;  %v967_v35 = vadd.f32 %v966_v26, %v965_v16  ;;  %v1768_v44 = vsel %vm1754_vm0, %v855_v29, %v743_v25  ;;  %v863_v54 = vadd.f32 %v269_v34, %v253_v33  ;;  %v429_v1 = vld [vmem:[%s3554_s23 + $0x698] sm:$0xff] }
  0x93   : > { %v1523_v14 = vadd.f32 %v1522_v6, %v1521_v62  ;;  %v1412_v21 = vrot.slane %v1411_v13, 2  ;;  %v1301_v28 = vadd.f32 %v1300_v18, %v1299_v10  ;;  %v1190_v30 = vrot.slane %v1189_v20, 1  ;;  %v445_v6 = vld [vmem:[%s3554_s23 + $0x718] sm:$0xff] }
  0x94   : > { %v1079_v36 = vadd.f32 %v1078_v27, %v1077_v17  ;;  %v1769_v49 = vsel %vm1756_vm1, %v967_v35, %v1768_v44  ;;  %v975_v58 = vadd.f32 %v301_v39, %v285_v38  ;;  %v753_v60 = vadd.f32 %v752_v53, %v751_v40  ;;  %v461_v7 = vld [vmem:[%s3554_s23 + $0x798] sm:$0xff] }
  0x95   : > { %v1524_v22 = vrot.slane %v1523_v14, 2  ;;  %v1413_v31 = vadd.f32 %v1412_v21, %v1411_v13  ;;  %v1302_v37 = vrot.slane %v1301_v28, 1  ;;  %v1191_v41 = vadd.f32 %v1190_v30, %v1189_v20 }
  0x96   : > { %v1770_v57 = vsel %vm1758_vm2, %v1079_v36, %v1769_v49  ;;  %v864_v61 = vrot.slane %v863_v54, 4  ;;  %v1087_v62 = vadd.f32 %v333_v46, %v317_v45  ;;  %v976_v2 = vrot.slane %v975_v58, 4  ;;  %v250_v49 = vld [vmem:[%s3554_s23 + $0x100] sm:$0xff] }
  0x97   : > { %v1525_v32 = vadd.f32 %v1524_v22, %v1523_v14  ;;  %v1414_v42 = vrot.slane %v1413_v31, 1  ;;  %v1303_v48 = vadd.f32 %v1302_v37, %v1301_v28  ;;  %v1771_v59 = vsel %vm1760_vm3, %v1191_v41, %v1770_v57  ;;  %v330_v57 = vld [vmem:[%s3554_s23 + $0x380] sm:$0xff] }
  0x98   : > { %v1199_v3 = vadd.f32 %v365_v50, %v349_v47  ;;  %v1311_v4 = vadd.f32 %v397_v52, %v381_v51  ;;  %v754_v8 = vrot.slane %v753_v60, 2  ;;  %v865_v9 = vadd.f32 %v864_v61, %v863_v54  ;;  %v266_v50 = vld [vmem:[%s3554_s23 + $0x180] sm:$0xff] }
  0x99   : > { %v1526_v43 = vrot.slane %v1525_v32, 1  ;;  %v1415_v55 = vadd.f32 %v1414_v42, %v1413_v31  ;;  %v1772_v63 = vsel %vm1762_vm4, %v1303_v48, %v1771_v59  ;;  %v1088_v10 = vrot.slane %v1087_v62, 4  ;;  %v218_v31 = vld [vmem:[%s3554_s23] sm:$0xff] }
  0x9a   : > { %v977_v12 = vadd.f32 %v976_v2, %v975_v58  ;;  %v1200_v13 = vrot.slane %v1199_v3, 4  ;;  %v1312_v14 = vrot.slane %v1311_v4, 4  ;;  %v755_v15 = vadd.f32 %v754_v8, %v753_v60  ;;  %v282_v51 = vld [vmem:[%s3554_s23 + $0x200] sm:$0xff] }
  0x9b   : > { %v1527_v56 = vadd.f32 %v1526_v43, %v1525_v32  ;;  %v1773_v5 = vsel %vm1764_vm5, %v1415_v55, %v1772_v63  ;;  %v866_v16 = vrot.slane %v865_v9, 2  ;;  %v1089_v17 = vadd.f32 %v1088_v10, %v1087_v62  ;;  %v234_v32 = vld [vmem:[%s3554_s23 + $0x80] sm:$0xff] }
  0x9c   : > { %v1423_v18 = vadd.f32 %v429_v1, %v413_v0  ;;  %v978_v19 = vrot.slane %v977_v12, 2  ;;  %v1201_v20 = vadd.f32 %v1200_v13, %v1199_v3  ;;  %v1313_v21 = vadd.f32 %v1312_v14, %v1311_v4  ;;  %v298_v55 = vld [vmem:[%s3554_s23 + $0x280] sm:$0xff] }
  0x9d   : > { %v1774_v11 = vsel %vm1766_vm6, %v1527_v56, %v1773_v5  ;;  %v1535_v22 = vadd.f32 %v461_v7, %v445_v6  ;;  %v756_v23 = vrot.slane %v755_v15, 1  ;;  %v867_v24 = vadd.f32 %v866_v16, %v865_v9  ;;  %v314_v56 = vld [vmem:[%s3554_s23 + $0x300] sm:$0xff] }
  0x9e   : > { %1953 = vmatprep.mubr.f32.mxu0 %v1774_v11  ;;  %v1090_v25 = vrot.slane %v1089_v17, 2  ;;  %v1424_v26 = vrot.slane %v1423_v18, 4  ;;  %v979_v27 = vadd.f32 %v978_v19, %v977_v12  ;;  %v1202_v28 = vrot.slane %v1201_v20, 2  ;;  %v346_v1 = vld [vmem:[%s3554_s23 + $0x400] sm:$0xff] }
  0x9f   : > { %v1314_v29 = vrot.slane %v1313_v21, 2  ;;  %v1536_v30 = vrot.slane %v1535_v22, 4  ;;  %v757_v33 = vadd.f32 %v756_v23, %v755_v15  ;;  %v868_v34 = vrot.slane %v867_v24, 1  ;;  %v362_v2 = vld [vmem:[%s3554_s23 + $0x480] sm:$0xff] }
  0xa0   : > { %v1091_v35 = vadd.f32 %v1090_v25, %v1089_v17  ;;  %v1425_v36 = vadd.f32 %v1424_v26, %v1423_v18  ;;  %v980_v37 = vrot.slane %v979_v27, 1  ;;  %v1203_v38 = vadd.f32 %v1202_v28, %v1201_v20  ;;  %v378_v7 = vld [vmem:[%s3554_s23 + $0x500] sm:$0xff] }
  0xa1   : > { %v1315_v39 = vadd.f32 %v1314_v29, %v1313_v21  ;;  %v1537_v40 = vadd.f32 %v1536_v30, %v1535_v22  ;;  %v869_v41 = vadd.f32 %v868_v34, %v867_v24  ;;  %v730_v44 = vadd.f32 %v234_v32, %v218_v31  ;;  %v394_v8 = vld [vmem:[%s3554_s23 + $0x580] sm:$0xff] }
  0xa2   : > { %v1092_v42 = vrot.slane %v1091_v35, 1  ;;  %v1426_v43 = vrot.slane %v1425_v36, 2  ;;  %v981_v45 = vadd.f32 %v980_v37, %v979_v27  ;;  %v1204_v46 = vrot.slane %v1203_v38, 1  ;;  %v410_v16 = vld [vmem:[%s3554_s23 + $0x600] sm:$0xff] }
  0xa3   : > { %v1316_v47 = vrot.slane %v1315_v39, 1  ;;  %v1538_v48 = vrot.slane %v1537_v40, 2  ;;  %v1782_v54 = vsel %vm1754_vm0, %v869_v41, %v757_v33  ;;  %v731_v58 = vrot.slane %v730_v44, 4  ;;  %v426_v17 = vld [vmem:[%s3554_s23 + $0x680] sm:$0xff] }
  0xa4   : > { %v1093_v52 = vadd.f32 %v1092_v42, %v1091_v35  ;;  %v1427_v53 = vadd.f32 %v1426_v43, %v1425_v36  ;;  %v1205_v59 = vadd.f32 %v1204_v46, %v1203_v38  ;;  %v1783_v62 = vsel %vm1756_vm1, %v981_v45, %v1782_v54  ;;  %v442_v22 = vld [vmem:[%s3554_s23 + $0x700] sm:$0xff] }
  0xa5   : > { %v1317_v60 = vadd.f32 %v1316_v47, %v1315_v39  ;;  %v1539_v61 = vadd.f32 %v1538_v48, %v1537_v40  ;;  %v732_v3 = vadd.f32 %v731_v58, %v730_v44  ;;  %v842_v4 = vadd.f32 %v266_v50, %v250_v49  ;;  %v458_v23 = vld [vmem:[%s3554_s23 + $0x780] sm:$0xff]  ;;  %v220_v39 = vld [vmem:[%s3554_s23 + $0x10] sm:$0xff] }
  0xa6   : > { %v1428_v63 = vrot.slane %v1427_v53, 1  ;;  %v1784_v0 = vsel %vm1758_vm2, %v1093_v52, %v1783_v62  ;;  %v954_v9 = vadd.f32 %v298_v55, %v282_v51  ;;  %v1066_v10 = vadd.f32 %v330_v57, %v314_v56  ;;  %v236_v40 = vld [vmem:[%s3554_s23 + $0x90] sm:$0xff] }
  0xa7   : > { %v1540_v5 = vrot.slane %v1539_v61, 1  ;;  %v1785_v6 = vsel %vm1760_vm3, %v1205_v59, %v1784_v0  ;;  %v733_v13 = vrot.slane %v732_v3, 2  ;;  %v843_v14 = vrot.slane %v842_v4, 4 }
  0xa8   : > { %v1429_v11 = vadd.f32 %v1428_v63, %v1427_v53  ;;  %v1786_v12 = vsel %vm1762_vm4, %v1317_v60, %v1785_v6  ;;  %v955_v18 = vrot.slane %v954_v9, 4  ;;  %v1067_v19 = vrot.slane %v1066_v10, 4  ;;  %v252_v60 = vld [vmem:[%s3554_s23 + $0x110] sm:$0xff] }
  0xa9   : > { %v1541_v15 = vadd.f32 %v1540_v5, %v1539_v61  ;;  %v1178_v20 = vadd.f32 %v362_v2, %v346_v1  ;;  %v734_v24 = vadd.f32 %v733_v13, %v732_v3  ;;  %v844_v25 = vadd.f32 %v843_v14, %v842_v4  ;;  %v268_v61 = vld [vmem:[%s3554_s23 + $0x190] sm:$0xff] }
  0xaa   : > { %v1787_v21 = vsel %vm1764_vm5, %v1429_v11, %v1786_v12  ;;  %v1290_v26 = vadd.f32 %v394_v8, %v378_v7  ;;  %v956_v28 = vadd.f32 %v955_v18, %v954_v9  ;;  %v1068_v29 = vadd.f32 %v1067_v19, %v1066_v10  ;;  %v284_v6 = vld [vmem:[%s3554_s23 + $0x210] sm:$0xff] }
  0xab   : > { %v1788_v27 = vsel %vm1766_vm6, %v1541_v15, %v1787_v21  ;;  %v1179_v30 = vrot.slane %v1178_v20, 4  ;;  %v735_v31 = vrot.slane %v734_v24, 1  ;;  %v845_v32 = vrot.slane %v844_v25, 2  ;;  %v300_v7 = vld [vmem:[%s3554_s23 + $0x290] sm:$0xff] }
  0xac   : > { %2023 = vmatprep.mubr.f32.mxu1 %v1788_v27  ;;  %v1291_v33 = vrot.slane %v1290_v26, 4  ;;  %v1402_v34 = vadd.f32 %v426_v17, %v410_v16  ;;  %v957_v35 = vrot.slane %v956_v28, 2  ;;  %v1069_v36 = vrot.slane %v1068_v29, 2  ;;  %v316_v12 = vld [vmem:[%s3554_s23 + $0x310] sm:$0xff] }
  0xad   : > { %v1180_v37 = vadd.f32 %v1179_v30, %v1178_v20  ;;  %v1514_v38 = vadd.f32 %v458_v23, %v442_v22  ;;  %v736_v41 = vadd.f32 %v735_v31, %v734_v24  ;;  %v846_v42 = vadd.f32 %v845_v32, %v844_v25  ;;  %v332_v13 = vld [vmem:[%s3554_s23 + $0x390] sm:$0xff] }
  0xae   : > { %v1292_v43 = vadd.f32 %v1291_v33, %v1290_v26  ;;  %v1403_v44 = vrot.slane %v1402_v34, 4  ;;  %v958_v45 = vadd.f32 %v957_v35, %v956_v28  ;;  %v1070_v46 = vadd.f32 %v1069_v36, %v1068_v29  ;;  %v348_v18 = vld [vmem:[%s3554_s23 + $0x410] sm:$0xff] }
  0xaf   : > { %v1181_v47 = vrot.slane %v1180_v37, 2  ;;  %v1515_v48 = vrot.slane %v1514_v38, 4  ;;  %v847_v49 = vrot.slane %v846_v42, 1  ;;  %v744_v52 = vadd.f32 %v236_v40, %v220_v39  ;;  %v364_v19 = vld [vmem:[%s3554_s23 + $0x490] sm:$0xff] }
  0xb0   : > { %v1293_v50 = vrot.slane %v1292_v43, 2  ;;  %v1404_v51 = vadd.f32 %v1403_v44, %v1402_v34  ;;  %v959_v53 = vrot.slane %v958_v45, 1  ;;  %v1071_v54 = vrot.slane %v1070_v46, 1  ;;  %v380_v23 = vld [vmem:[%s3554_s23 + $0x510] sm:$0xff] }
  0xb1   : > { %v1182_v55 = vadd.f32 %v1181_v47, %v1180_v37  ;;  %v1516_v56 = vadd.f32 %v1515_v48, %v1514_v38  ;;  %v848_v57 = vadd.f32 %v847_v49, %v846_v42  ;;  %v745_v62 = vrot.slane %v744_v52, 4  ;;  %v396_v24 = vld [vmem:[%s3554_s23 + $0x590] sm:$0xff]  ;;  %v554_v47 = vld [vmem:[#allocation5 + $0x280] sm:$0xff]  ;;  %v555_v48 = vld [vmem:[#allocation5 + $0x288] sm:$0xff] }
  0xb2   : > { %v1294_v58 = vadd.f32 %v1293_v50, %v1292_v43  ;;  %v1405_v59 = vrot.slane %v1404_v51, 2  ;;  %v960_v63 = vadd.f32 %v959_v53, %v958_v45  ;;  %v1072_v0 = vadd.f32 %v1071_v54, %v1070_v46  ;;  %v412_v32 = vld [vmem:[%s3554_s23 + $0x610] sm:$0xff] }
  0xb3   : > { %v1183_v1 = vrot.slane %v1182_v55, 1  ;;  %v1517_v2 = vrot.slane %v1516_v56, 2  ;;  %v1755_v5 = vsel %vm1754_vm0, %v848_v57, %v736_v41  ;;  %v746_v8 = vadd.f32 %v745_v62, %v744_v52  ;;  %v428_v33 = vld [vmem:[%s3554_s23 + $0x690] sm:$0xff]  ;;  %v538_v57 = vld [vmem:[#allocation5 + $0x200] sm:$0xff] }
  0xb4   : > { %v1295_v3 = vrot.slane %v1294_v58, 1  ;;  %v1406_v4 = vadd.f32 %v1405_v59, %v1404_v51  ;;  %v1757_v11 = vsel %vm1756_vm1, %v960_v63, %v1755_v5  ;;  %v856_v14 = vadd.f32 %v268_v61, %v252_v60  ;;  %v444_v38 = vld [vmem:[%s3554_s23 + $0x710] sm:$0xff] }
  0xb5   : > { %v1184_v9 = vadd.f32 %v1183_v1, %v1182_v55  ;;  %v1518_v10 = vadd.f32 %v1517_v2, %v1516_v56  ;;  %v1759_v17 = vsel %vm1758_vm2, %v1072_v0, %v1757_v11  ;;  %v747_v20 = vrot.slane %v746_v8, 2  ;;  %v460_v39 = vld [vmem:[%s3554_s23 + $0x790] sm:$0xff] }
  0xb6   : > { %v1296_v15 = vadd.f32 %v1295_v3, %v1294_v58  ;;  %v1407_v16 = vrot.slane %v1406_v4, 1  ;;  %v857_v25 = vrot.slane %v856_v14, 4  ;;  %v968_v26 = vadd.f32 %v300_v7, %v284_v6  ;;  %v539_v58 = vld [vmem:[#allocation5 + $0x208] sm:$0xff]  ;;  %v586_v3 = vld [vmem:[#allocation5 + $0x380] sm:$0xff]  ;;  %v556_v11 = vld [vmem:[#allocation5 + $0x290] sm:$0xff] }
  0xb7   : > { %v1519_v21 = vrot.slane %v1518_v10, 1  ;;  %v1761_v22 = vsel %vm1760_vm3, %v1184_v9, %v1759_v17  ;;  %v748_v29 = vadd.f32 %v747_v20, %v746_v8  ;;  %v1080_v30 = vadd.f32 %v332_v13, %v316_v12  ;;  %v3682_v9 = vld [vmem:[#allocation5 + $0x300] sm:$0xff]  ;;  %v3686_v17 = vld [vmem:[#allocation5 + $0x210] sm:$0xff] }
  0xb8   : > { %v1408_v27 = vadd.f32 %v1407_v16, %v1406_v4  ;;  %v1763_v28 = vsel %vm1762_vm4, %v1296_v15, %v1761_v22  ;;  %v858_v34 = vadd.f32 %v857_v25, %v856_v14  ;;  %v969_v35 = vrot.slane %v968_v26, 4  ;;  %v587_v4 = vld [vmem:[#allocation5 + $0x388] sm:$0xff]  ;;  %v557_v16 = vld [vmem:[#allocation5 + $0x298] sm:$0xff]  ;;  %v3694_v25 = vld [vmem:[#allocation5 + $0x310] sm:$0xff] }
  0xb9   : > { %v1520_v31 = vadd.f32 %v1519_v21, %v1518_v10  ;;  %v1192_v36 = vadd.f32 %v364_v19, %v348_v18  ;;  %v749_v40 = vrot.slane %v748_v29, 1  ;;  %v1081_v41 = vrot.slane %v1080_v30, 4  ;;  %v3684_v10 = vld [vmem:[#allocation5 + $0x308] sm:$0xff]  ;;  %v3688_v18 = vld [vmem:[#allocation5 + $0x218] sm:$0xff] }
  0xba   : > { %v1765_v37 = vsel %vm1764_vm5, %v1408_v27, %v1763_v28  ;;  %v1304_v42 = vadd.f32 %v396_v24, %v380_v23  ;;  %v859_v44 = vrot.slane %v858_v34, 2  ;;  %v970_v45 = vadd.f32 %v969_v35, %v968_v26  ;;  %v3690_v23 = vld [vmem:[#allocation5 + $0x390] sm:$0xff]  ;;  %v3692_v24 = vld [vmem:[#allocation5 + $0x398] sm:$0xff] }
  0xbb   : > { %v1767_v43 = vsel %vm1766_vm6, %v1520_v31, %v1765_v37  ;;  %v1193_v46 = vrot.slane %v1192_v36, 4  ;;  %v750_v49 = vadd.f32 %v749_v40, %v748_v29  ;;  %v1082_v50 = vadd.f32 %v1081_v41, %v1080_v30  ;;  %v3696_v26 = vld [vmem:[#allocation5 + $0x318] sm:$0xff]  ;;  %v3699_v31 = vld [vmem:[#allocation5 + $0x2a0] sm:$0xff]  ;;  %v3711_v40 = vld [vmem:[#allocation5 + $0x3a8] sm:$0xff] }
  0xbc   : > { %1954 = vmatmul.mubr.f32.vlgmr.msra.gmra.mrb[0].mxu0 %v1767_v43  ;;  %v1305_v51 = vrot.slane %v1304_v42, 4  ;;  %v1416_v52 = vadd.f32 %v428_v33, %v412_v32  ;;  %v860_v53 = vadd.f32 %v859_v44, %v858_v34  ;;  %v971_v54 = vrot.slane %v970_v45, 2  ;;  %v3701_v32 = vld [vmem:[#allocation5 + $0x2a8] sm:$0xff]  ;;  %v3703_v33 = vld [vmem:[#allocation5 + $0x220] sm:$0xff]  ;;  %v3717_v43 = vld [vmem:[#allocation5 + $0x2b0] sm:$0xff] }
  0xbd   : > { %v1194_v55 = vadd.f32 %v1193_v46, %v1192_v36  ;;  %v1528_v56 = vadd.f32 %v460_v39, %v444_v38  ;;  %v1083_v59 = vrot.slane %v1082_v50, 2  ;;  %v2927_v62 = vpack.c.bf16 %v555_v48, %v554_v47  ;;  %v3705_v34 = vld [vmem:[#allocation5 + $0x228] sm:$0xff]  ;;  %v3709_v39 = vld [vmem:[#allocation5 + $0x3a0] sm:$0xff]  ;;  %v3719_v44 = vld [vmem:[#allocation5 + $0x2b8] sm:$0xff] }
  0xbe   : > { %v1306_v60 = vadd.f32 %v1305_v51, %v1304_v42  ;;  %v1417_v61 = vrot.slane %v1416_v52, 4  ;;  %v861_v63 = vrot.slane %v860_v53, 1  ;;  %v972_v0 = vadd.f32 %v971_v54, %v970_v45  ;;  %v3713_v41 = vld [vmem:[#allocation5 + $0x320] sm:$0xff]  ;;  %v3715_v42 = vld [vmem:[#allocation5 + $0x328] sm:$0xff]  ;;  %v3726_v51 = vld [vmem:[#allocation5 + $0x3b0] sm:$0xff] }
  0xbf   : > { %v1195_v1 = vrot.slane %v1194_v55, 2  ;;  %v1529_v2 = vrot.slane %v1528_v56, 4  ;;  %v1084_v5 = vadd.f32 %v1083_v59, %v1082_v50  ;;  %2928 = vmatprep.subr.bf16.mxu0 %v2927_v62  ;;  %v2929_v8 = vpack.c.bf16 %v539_v58, %v538_v57  ;;  %v3724_v50 = vld [vmem:[#allocation5 + $0x238] sm:$0xff]  ;;  %v3737_v59 = vld [vmem:[#allocation5 + $0x2c0] sm:$0xff]  ;;  %v3743_v62 = vld [vmem:[#allocation5 + $0x248] sm:$0xff] }
  0xc0   : > { %v1307_v6 = vrot.slane %v1306_v60, 2  ;;  %v1418_v7 = vadd.f32 %v1417_v61, %v1416_v52  ;;  %v862_v12 = vadd.f32 %v861_v63, %v860_v53  ;;  %v973_v13 = vrot.slane %v972_v0, 1  ;;  %v3728_v52 = vld [vmem:[#allocation5 + $0x3b8] sm:$0xff]  ;;  %v3730_v53 = vld [vmem:[#allocation5 + $0x330] sm:$0xff]  ;;  %v3741_v61 = vld [vmem:[#allocation5 + $0x240] sm:$0xff] }
  0xc1   : > { %v1196_v14 = vadd.f32 %v1195_v1, %v1194_v55  ;;  %v1530_v15 = vadd.f32 %v1529_v2, %v1528_v56  ;;  %v1085_v19 = vrot.slane %v1084_v5, 1  ;;  %2930 = vmatpush3.bf16.msra.mxu0 %v2929_v8  ;;  %v2959_v22 = vpack.c.bf16 %v587_v4, %v586_v3  ;;  %v3732_v54 = vld [vmem:[#allocation5 + $0x338] sm:$0xff]  ;;  %v3745_v63 = vld [vmem:[#allocation5 + $0x3c0] sm:$0xff]  ;;  %v319_v4 = vld [vmem:[%s3554_s23 + $0x328] sm:$0xff] }
  0xc2   : > { %v1308_v20 = vadd.f32 %v1307_v6, %v1306_v60  ;;  %v1419_v21 = vrot.slane %v1418_v7, 2  ;;  %v974_v27 = vadd.f32 %v973_v13, %v972_v0  ;;  %v1775_v30 = vsel %vm1754_vm0, %v862_v12, %v750_v49  ;;  %v3722_v49 = vld [vmem:[#allocation5 + $0x230] sm:$0xff]  ;;  %v3739_v60 = vld [vmem:[#allocation5 + $0x2c8] sm:$0xff]  ;;  %v3760_v8 = vld [vmem:[#allocation5 + $0x2d8] sm:$0xff] }
  0xc3   : > { %v1197_v28 = vrot.slane %v1196_v14, 1  ;;  %v1531_v29 = vrot.slane %v1530_v15, 2  ;;  %v1086_v35 = vadd.f32 %v1085_v19, %v1084_v5  ;;  %2960 = vmatprep.subr.bf16.mxu1 %v2959_v22  ;;  %v2961_v38 = vpack.c.bf16 %v3684_v10, %v3682_v9  ;;  %v3747_v0 = vld [vmem:[#allocation5 + $0x3c8] sm:$0xff]  ;;  %v3754_v5 = vld [vmem:[#allocation5 + $0x340] sm:$0xff]  ;;  %v3764_v12 = vld [vmem:[#allocation5 + $0x258] sm:$0xff] }
  0xc4   : > { %v1309_v36 = vrot.slane %v1308_v20, 1  ;;  %v1420_v37 = vadd.f32 %v1419_v21, %v1418_v7  ;;  %v1776_v47 = vsel %vm1756_vm1, %v974_v27, %v1775_v30  ;;  %v2931_v48 = vpack.c.bf16 %v557_v16, %v556_v11  ;;  %v3756_v6 = vld [vmem:[#allocation5 + $0x348] sm:$0xff]  ;;  %v3758_v7 = vld [vmem:[#allocation5 + $0x2d0] sm:$0xff]  ;;  %v3779_v21 = vld [vmem:[#allocation5 + $0x2e0] sm:$0xff] }
  0xc5   : > { %v1198_v45 = vadd.f32 %v1197_v28, %v1196_v14  ;;  %v1532_v46 = vadd.f32 %v1531_v29, %v1530_v15  ;;  %v1777_v57 = vsel %vm1758_vm2, %v1086_v35, %v1776_v47  ;;  %v2933_v58 = vpack.c.bf16 %v3688_v18, %v3686_v17  ;;  %v3762_v11 = vld [vmem:[#allocation5 + $0x250] sm:$0xff]  ;;  %v3773_v18 = vld [vmem:[#allocation5 + $0x3d8] sm:$0xff]  ;;  %v3781_v22 = vld [vmem:[#allocation5 + $0x2e8] sm:$0xff] }
  0xc6   : > { %v1310_v55 = vadd.f32 %v1309_v36, %v1308_v20  ;;  %v1421_v56 = vrot.slane %v1420_v37, 1  ;;  %2932 = vmatprep.subr.bf16.mxu0 %v2931_v48  ;;  %v2963_v3 = vpack.c.bf16 %v3692_v24, %v3690_v23  ;;  %v2935_v15 = vpack.c.bf16 %v3701_v32, %v3699_v31  ;;  %v3771_v17 = vld [vmem:[#allocation5 + $0x3d0] sm:$0xff]  ;;  %v3777_v20 = vld [vmem:[#allocation5 + $0x358] sm:$0xff]  ;;  %v3789_v31 = vld [vmem:[#allocation5 + $0x260] sm:$0xff] }
  0xc7   : > { %v1533_v1 = vrot.slane %v1532_v46, 1  ;;  %v1778_v2 = vsel %vm1760_vm3, %v1198_v45, %v1777_v57  ;;  %2934 = vmatpush3.bf16.msra.mxu0 %v2933_v58  ;;  %v2937_v16 = vpack.c.bf16 %v3705_v34, %v3703_v33  ;;  %v3775_v19 = vld [vmem:[#allocation5 + $0x350] sm:$0xff]  ;;  %v2939_v30 = vpack.c.bf16 %v3719_v44, %v3717_v43  ;;  %v3791_v32 = vld [vmem:[#allocation5 + $0x268] sm:$0xff]  ;;  %v3793_v33 = vld [vmem:[#allocation5 + $0x3e0] sm:$0xff] }
  0xc8   : > { %v1422_v13 = vadd.f32 %v1421_v56, %v1420_v37  ;;  %v1779_v14 = vsel %vm1762_vm4, %v1310_v55, %v1778_v2  ;;  %4702 = vst [vmem:[#allocation12_spill] sm:$0xff] %v3793_v33  ;;  %v3795_v34 = vld [vmem:[#allocation5 + $0x3e8] sm:$0xff]  ;;  %v3797_v35 = vld [vmem:[#allocation5 + $0x360] sm:$0xff]  ;;  %v3801_v37 = vld [vmem:[#allocation5 + $0x2f0] sm:$0xff]  ;;  %2936 = vmatprep.subr.bf16.mxu0 %v2935_v15  ;;  %v2941_v44 = vpack.c.bf16 %v3724_v50, %v3722_v49 }
  0xc9   : > { %v1534_v27 = vadd.f32 %v1533_v1, %v1532_v46  ;;  %4703 = vst [vmem:[#allocation13_spill] sm:$0xff] %v3797_v35  ;;  %v3799_v36 = vld [vmem:[#allocation5 + $0x368] sm:$0xff]  ;;  %v3803_v45 = vld [vmem:[#allocation5 + $0x2f8] sm:$0xff]  ;;  %v3812_v48 = vld [vmem:[#allocation5 + $0x270] sm:$0xff]  ;;  %v4706_v23 = vpack.c.bf16 %v3711_v40, %v3709_v39 }
  0xca   : > { %4704 = vst [vmem:[#allocation14_spill] sm:$0xff] %v3799_v36  ;;  %v1780_v43 = vsel %vm1764_vm5, %v1422_v13, %v1779_v14  ;;  %v3814_v55 = vld [vmem:[#allocation5 + $0x278] sm:$0xff]  ;;  %v3816_v56 = vld [vmem:[#allocation5 + $0x3f0] sm:$0xff]  ;;  %v223_v50 = vld [vmem:[%s3554_s23 + $0x28] sm:$0xff]  ;;  %v2943_v13 = vpack.c.bf16 %v3739_v60, %v3737_v59  ;;  %v2945_v14 = vpack.c.bf16 %v3743_v62, %v3741_v61  ;;  %v2947_v59 = vpack.c.bf16 %v3760_v8, %v3758_v7 }
  0xcb   : > { %v3818_v57 = vld [vmem:[#allocation5 + $0x3f8] sm:$0xff]  ;;  %v3820_v58 = vld [vmem:[#allocation5 + $0x370] sm:$0xff]  ;;  %v239_v1 = vld [vmem:[%s3554_s23 + $0xa8] sm:$0xff]  ;;  %v1781_v2 = vsel %vm1766_vm6, %v1534_v27, %v1780_v43  ;;  %2938 = vmatpush3.bf16.msra.mxu0 %v2937_v16  ;;  %v2951_v8 = vpack.c.bf16 %v3781_v22, %v3779_v21 }
  0xcc   : > { %v3822_v49 = vld [vmem:[#allocation5 + $0x378] sm:$0xff]  ;;  %v255_v47 = vld [vmem:[%s3554_s23 + $0x128] sm:$0xff]  ;;  %2024 = vmatmul.mubr.f32.vlgmr.msra.gmra.mrb[0].mxu1 %v1781_v2  ;;  %2940 = vmatprep.subr.bf16.mxu0 %v2939_v30  ;;  %v4705_v30 = vpack.c.bf16 %v3696_v26, %v3694_v25 }
  0xcd   : > { %v271_v46 = vld [vmem:[%s3554_s23 + $0x1a8] sm:$0xff]  ;;  %2962 = vmatpush3.bf16.msra.mxu1 %v2961_v38 }
  0xce   : > { %v287_v29 = vld [vmem:[%s3554_s23 + $0x228] sm:$0xff]  ;;  %2964 = vmatprep.subr.bf16.mxu1 %v2963_v3  ;;  %v765_v3 = vadd.f32 %v239_v1, %v223_v50  ;;  %v877_v10 = vadd.f32 %v271_v46, %v255_v47 }
  0xcf   : > { %v303_v28 = vld [vmem:[%s3554_s23 + $0x2a8] sm:$0xff]  ;;  %2942 = vmatpush3.bf16.msra.mxu0 %v2941_v44 }
  0xd0   : > { %v335_v61 = vld [vmem:[%s3554_s23 + $0x3a8] sm:$0xff]  ;;  %v989_v9 = vadd.f32 %v303_v28, %v287_v29  ;;  %2944 = vmatprep.subr.bf16.mxu0 %v2943_v13  ;;  %v766_v35 = vrot.slane %v765_v3, 4  ;;  %v878_v24 = vrot.slane %v877_v10, 4 }
  0xd1   : > { %v351_v62 = vld [vmem:[%s3554_s23 + $0x428] sm:$0xff]  ;;  %v1101_v38 = vadd.f32 %v335_v61, %v319_v4  ;;  %2966 = vmatpush3.bf16.msra.mxu1 %v4705_v30 }
  0xd2   : > { %v367_v43 = vld [vmem:[%s3554_s23 + $0x4a8] sm:$0xff]  ;;  %2968 = vmatprep.subr.bf16.mxu1 %v4706_v23  ;;  %v990_v50 = vrot.slane %v989_v9, 4  ;;  %v767_v28 = vadd.f32 %v766_v35, %v765_v3  ;;  %v879_v25 = vadd.f32 %v878_v24, %v877_v10  ;;  %v4708_v35 = vpack.c.bf16 %v3728_v52, %v3726_v51  ;;  %v286_v3 = vld [vmem:[%s3554_s23 + $0x220] sm:$0xff] }
  0xd3   : > { %v383_v2 = vld [vmem:[%s3554_s23 + $0x528] sm:$0xff]  ;;  %v1213_v60 = vadd.f32 %v367_v43, %v351_v62  ;;  %v1102_v44 = vrot.slane %v1101_v38, 4  ;;  %2946 = vmatpush3.bf16.msra.mxu0 %v2945_v14  ;;  %v4711_v23 = vpack.c.bf16 %v3747_v0, %v3745_v63  ;;  %v4712_v63 = vpack.c.bf16 %v3791_v32, %v3789_v31 }
  0xd4   : > { %v399_v27 = vld [vmem:[%s3554_s23 + $0x5a8] sm:$0xff]  ;;  %v991_v26 = vadd.f32 %v990_v50, %v989_v9  ;;  %2948 = vmatprep.subr.bf16.mxu0 %v2947_v59  ;;  %v768_v39 = vrot.slane %v767_v28, 2  ;;  %v880_v62 = vrot.slane %v879_v25, 2  ;;  %v302_v50 = vld [vmem:[%s3554_s23 + $0x2a0] sm:$0xff]  ;;  %v4715_v31 = vpack.c.bf16 %v3773_v18, %v3771_v17 }
  0xd5   : > { %v415_v15 = vld [vmem:[%s3554_s23 + $0x628] sm:$0xff]  ;;  %v1325_v36 = vadd.f32 %v399_v27, %v383_v2  ;;  %v1214_v46 = vrot.slane %v1213_v60, 4  ;;  %v1103_v1 = vadd.f32 %v1102_v44, %v1101_v38 }
  0xd6   : > { %v431_v21 = vld [vmem:[%s3554_s23 + $0x6a8] sm:$0xff]  ;;  %v992_v43 = vrot.slane %v991_v26, 2  ;;  %v769_v2 = vadd.f32 %v768_v39, %v767_v28  ;;  %v382_v39 = vld [vmem:[%s3554_s23 + $0x520] sm:$0xff] }
  0xd7   : > { %v447_v22 = vld [vmem:[%s3554_s23 + $0x728] sm:$0xff]  ;;  %v1437_v16 = vadd.f32 %v431_v21, %v415_v15  ;;  %v1326_v4 = vrot.slane %v1325_v36, 4  ;;  %v1215_v13 = vadd.f32 %v1214_v46, %v1213_v60  ;;  %v4707_v15 = vpack.c.bf16 %v3715_v42, %v3713_v41  ;;  %v222_v21 = vld [vmem:[%s3554_s23 + $0x20] sm:$0xff] }
  0xd8   : > { %v463_v7 = vld [vmem:[%s3554_s23 + $0x7a8] sm:$0xff]  ;;  %v1104_v14 = vrot.slane %v1103_v1, 2  ;;  %v993_v59 = vadd.f32 %v992_v43, %v991_v26  ;;  %v770_v9 = vrot.slane %v769_v2, 1 }
  0xd9   : > { %v1549_v33 = vadd.f32 %v463_v7, %v447_v22  ;;  %v1438_v29 = vrot.slane %v1437_v16, 4  ;;  %2970 = vmatpush3.bf16.msra.mxu1 %v4707_v15  ;;  %v1327_v40 = vadd.f32 %v1326_v4, %v1325_v36  ;;  %v1216_v7 = vrot.slane %v1215_v13, 2  ;;  %v270_v22 = vld [vmem:[%s3554_s23 + $0x1a0] sm:$0xff] }
  0xda   : > { %2972 = vmatprep.subr.bf16.mxu1 %v4708_v35  ;;  %v4709_v36 = vpack.c.bf16 %v3764_v12, %v3762_v11  ;;  %v1105_v51 = vadd.f32 %v1104_v14, %v1103_v1  ;;  %v238_v11 = vld [vmem:[%s3554_s23 + $0xa0] sm:$0xff]  ;;  %v771_v44 = vadd.f32 %v770_v9, %v769_v2  ;;  %v982_v2 = vadd.f32 %v302_v50, %v286_v3 }
  0xdb   : > { %v1550_v47 = vrot.slane %v1549_v33, 4  ;;  %v1439_v27 = vadd.f32 %v1438_v29, %v1437_v16  ;;  %v1328_v60 = vrot.slane %v1327_v40, 2  ;;  %v1217_v52 = vadd.f32 %v1216_v7, %v1215_v13  ;;  %v254_v12 = vld [vmem:[%s3554_s23 + $0x120] sm:$0xff] }
  0xdc   : > { %2950 = vmatpush3.bf16.msra.mxu0 %v4709_v36  ;;  %v4710_v16 = vpack.c.bf16 %v3732_v54, %v3730_v53  ;;  %v994_v54 = vrot.slane %v993_v59, 1  ;;  %v1106_v24 = vrot.slane %v1105_v51, 1  ;;  %v318_v29 = vld [vmem:[%s3554_s23 + $0x320] sm:$0xff]  ;;  %v758_v14 = vadd.f32 %v238_v11, %v222_v21 }
  0xdd   : > { %v1551_v61 = vadd.f32 %v1550_v47, %v1549_v33  ;;  %v1440_v41 = vrot.slane %v1439_v27, 2  ;;  %v881_v33 = vadd.f32 %v880_v62, %v879_v25  ;;  %2952 = vmatprep.subr.bf16.mxu0 %v2951_v8  ;;  %v1329_v10 = vadd.f32 %v1328_v60, %v1327_v40  ;;  %v334_v47 = vld [vmem:[%s3554_s23 + $0x3a0] sm:$0xff] }
  0xde   : > { %2974 = vmatpush3.bf16.msra.mxu1 %v4710_v16  ;;  %v1218_v8 = vrot.slane %v1217_v52, 1  ;;  %v350_v25 = vld [vmem:[%s3554_s23 + $0x420] sm:$0xff]  ;;  %v995_v26 = vadd.f32 %v994_v54, %v993_v59  ;;  %v1107_v1 = vadd.f32 %v1106_v24, %v1105_v51  ;;  %v870_v7 = vadd.f32 %v270_v22, %v254_v12  ;;  %v4718_v16 = vld [vmem:[#allocation12_spill] sm:$0xff] }
  0xdf   : > { %v1552_v42 = vrot.slane %v1551_v61, 2  ;;  %v1441_v38 = vadd.f32 %v1440_v41, %v1439_v27  ;;  %2976 = vmatprep.subr.bf16.mxu1 %v4711_v23  ;;  %v882_v53 = vrot.slane %v881_v33, 1  ;;  %v1330_v46 = vrot.slane %v1329_v10, 1  ;;  %v366_v15 = vld [vmem:[%s3554_s23 + $0x4a0] sm:$0xff] }
  0xe0   : > { %2954 = vmatpush3.bf16.msra.mxu0 %v4712_v63  ;;  %v1219_v13 = vadd.f32 %v1218_v8, %v1217_v52  ;;  %v398_v40 = vld [vmem:[%s3554_s23 + $0x5a0] sm:$0xff]  ;;  %v4713_v27 = vpack.c.bf16 %v3756_v6, %v3754_v5  ;;  %v1094_v5 = vadd.f32 %v334_v47, %v318_v29  ;;  %v1206_v6 = vadd.f32 %v366_v15, %v350_v25 }
  0xe1   : > { %v1553_v30 = vadd.f32 %v1552_v42, %v1551_v61  ;;  %v1442_v28 = vrot.slane %v1441_v38, 1  ;;  %v883_v0 = vadd.f32 %v882_v53, %v881_v33  ;;  %v4714_v61 = vpack.c.bf16 %v3803_v45, %v3801_v37  ;;  %v414_v9 = vld [vmem:[%s3554_s23 + $0x620] sm:$0xff] }
  0xe2   : > { %2978 = vmatpush3.bf16.msra.mxu1 %v4713_v27  ;;  %v1331_v35 = vadd.f32 %v1330_v46, %v1329_v10  ;;  %v1318_v37 = vadd.f32 %v398_v40, %v382_v39  ;;  %v4716_v45 = vpack.c.bf16 %v3814_v55, %v3812_v48  ;;  %v759_v17 = vrot.slane %v758_v14, 4  ;;  %v430_v10 = vld [vmem:[%s3554_s23 + $0x6a0] sm:$0xff] }
  0xe3   : > { %v1554_v4 = vrot.slane %v1553_v30, 1  ;;  %2956 = vmatprep.subr.bf16.mxu0 %v4714_v61  ;;  %v1443_v62 = vadd.f32 %v1442_v28, %v1441_v38  ;;  %2980 = vmatprep.subr.bf16.mxu1 %v4715_v31  ;;  %v1796_v32 = vsel %vm1754_vm0, %v883_v0, %v771_v44  ;;  %v871_v18 = vrot.slane %v870_v7, 4  ;;  %v4720_v8 = vld [vmem:[#allocation14_spill] sm:$0xff]  ;;  %v4721_v3 = vld [vmem:[#allocation13_spill] sm:$0xff] }
  0xe4   : > { %v1797_v60 = vsel %vm1756_vm1, %v995_v26, %v1796_v32  ;;  %2958 = vmatpush3.bf16.msra.mxu0 %v4716_v45  ;;  %v983_v42 = vrot.slane %v982_v2, 4  ;;  %v4717_v36 = vpack.c.bf16 %v3777_v20, %v3775_v19  ;;  %v1095_v59 = vrot.slane %v1094_v5, 4  ;;  %v446_v19 = vld [vmem:[%s3554_s23 + $0x720] sm:$0xff]  ;;  %v273_v45 = vld [vmem:[%s3554_s23 + $0x1b8] sm:$0xff] }
  0xe5   : > { %v1555_v43 = vadd.f32 %v1554_v4, %v1553_v30  ;;  %v1798_v41 = vsel %vm1758_vm2, %v1107_v1, %v1797_v60  ;;  %v1207_v51 = vrot.slane %v1206_v6, 4  ;;  %v1319_v52 = vrot.slane %v1318_v37, 4  ;;  %v462_v20 = vld [vmem:[%s3554_s23 + $0x7a0] sm:$0xff] }
  0xe6   : > { %2982 = vmatpush3.bf16.msra.mxu1 %v4717_v36  ;;  %v1799_v33 = vsel %vm1760_vm3, %v1219_v13, %v1798_v41  ;;  %v4719_v48 = vpack.c.bf16 %v3795_v34, %v4718_v16  ;;  %v760_v38 = vadd.f32 %v759_v17, %v758_v14  ;;  %v872_v30 = vadd.f32 %v871_v18, %v870_v7  ;;  %v225_v14 = vld [vmem:[%s3554_s23 + $0x38] sm:$0xff] }
  0xe7   : > { %v1800_v55 = vsel %vm1762_vm4, %v1331_v35, %v1799_v33  ;;  %v984_v21 = vadd.f32 %v983_v42, %v982_v2  ;;  %v1096_v12 = vadd.f32 %v1095_v59, %v1094_v5  ;;  %v1208_v22 = vadd.f32 %v1207_v51, %v1206_v6  ;;  %v618_v35 = vld [vmem:[#allocation5 + $0x480] sm:$0xff]  ;;  %v241_v7 = vld [vmem:[%s3554_s23 + $0xb8] sm:$0xff] }
  0xe8   : > { %2984 = vmatprep.subr.bf16.mxu1 %v4719_v48  ;;  %v1801_v11 = vsel %vm1764_vm5, %v1443_v62, %v1800_v55  ;;  %v1320_v23 = vadd.f32 %v1319_v52, %v1318_v37  ;;  %v761_v54 = vrot.slane %v760_v38, 2  ;;  %v873_v24 = vrot.slane %v872_v30, 2  ;;  %v257_v2 = vld [vmem:[%s3554_s23 + $0x138] sm:$0xff] }
  0xe9   : > { %v1802_v53 = vsel %vm1766_vm6, %v1555_v43, %v1801_v11  ;;  %v985_v34 = vrot.slane %v984_v21, 2  ;;  %v4722_v50 = vpack.c.bf16 %v4720_v8, %v4721_v3  ;;  %v1097_v44 = vrot.slane %v1096_v12, 2  ;;  %v289_v41 = vld [vmem:[%s3554_s23 + $0x238] sm:$0xff] }
  0xea   : > { %2093 = vmatprep.mubr.f32.mxu0 %v1802_v53  ;;  %v1209_v46 = vrot.slane %v1208_v22, 2  ;;  %v1321_v28 = vrot.slane %v1320_v23, 2  ;;  %v1430_v4 = vadd.f32 %v430_v10, %v414_v9  ;;  %v4723_v29 = vpack.c.bf16 %v3818_v57, %v3816_v56  ;;  %v619_v56 = vld [vmem:[#allocation5 + $0x488] sm:$0xff]  ;;  %v305_v17 = vld [vmem:[%s3554_s23 + $0x2b8] sm:$0xff] }
  0xeb   : > { %2986 = vmatpush3.bf16.msra.mxu1 %v4722_v50  ;;  %v762_v47 = vadd.f32 %v761_v54, %v760_v38  ;;  %v874_v25 = vadd.f32 %v873_v24, %v872_v30  ;;  %v986_v63 = vadd.f32 %v985_v34, %v984_v21  ;;  %v1542_v0 = vadd.f32 %v462_v20, %v446_v19  ;;  %v321_v36 = vld [vmem:[%s3554_s23 + $0x338] sm:$0xff] }
  0xec   : > { %2988 = vmatprep.subr.bf16.mxu1 %v4723_v29  ;;  %v1098_v26 = vadd.f32 %v1097_v44, %v1096_v12  ;;  %v1210_v1 = vadd.f32 %v1209_v46, %v1208_v22  ;;  %v1322_v13 = vadd.f32 %v1321_v28, %v1320_v23  ;;  %v1431_v15 = vrot.slane %v1430_v4, 4  ;;  %v337_v33 = vld [vmem:[%s3554_s23 + $0x3b8] sm:$0xff] }
  0xed   : > { %v763_v39 = vrot.slane %v762_v47, 1  ;;  %v875_v40 = vrot.slane %v874_v25, 1  ;;  %v987_v27 = vrot.slane %v986_v63, 1  ;;  %v1543_v61 = vrot.slane %v1542_v0, 4  ;;  %v353_v21 = vld [vmem:[%s3554_s23 + $0x438] sm:$0xff] }
  0xee   : > { %v4724_v57 = vpack.c.bf16 %v3822_v49, %v3820_v58  ;;  %v1099_v62 = vrot.slane %v1098_v26, 1  ;;  %v1211_v43 = vrot.slane %v1210_v1, 1  ;;  %v1323_v31 = vrot.slane %v1322_v13, 1  ;;  %v369_v11 = vld [vmem:[%s3554_s23 + $0x4b8] sm:$0xff] }
  0xef   : > { %v1432_v32 = vadd.f32 %v1431_v15, %v1430_v4  ;;  %v764_v60 = vadd.f32 %v763_v39, %v762_v47  ;;  %v876_v5 = vadd.f32 %v875_v40, %v874_v25  ;;  %v988_v6 = vadd.f32 %v987_v27, %v986_v63  ;;  %v385_v23 = vld [vmem:[%s3554_s23 + $0x538] sm:$0xff] }
  0xf0   : > { %2990 = vmatpush3.bf16.msra.mxu1 %v4724_v57  ;;  %v1544_v37 = vadd.f32 %v1543_v61, %v1542_v0  ;;  %v1100_v18 = vadd.f32 %v1099_v62, %v1098_v26  ;;  %v1212_v42 = vadd.f32 %v1211_v43, %v1210_v1  ;;  %v1324_v58 = vadd.f32 %v1323_v31, %v1322_v13  ;;  %v401_v53 = vld [vmem:[%s3554_s23 + $0x5b8] sm:$0xff] }
  0xf1   : > { %v1433_v49 = vrot.slane %v1432_v32, 2  ;;  %v1789_v51 = vsel %vm1754_vm0, %v876_v5, %v764_v60  ;;  %v2991_v52 = vpack.c.bf16 %v619_v56, %v618_v35  ;;  %v779_v16 = vadd.f32 %v241_v7, %v225_v14  ;;  %v417_v47 = vld [vmem:[%s3554_s23 + $0x638] sm:$0xff] }
  0xf2   : > { %v1545_v59 = vrot.slane %v1544_v37, 2  ;;  %v1790_v55 = vsel %vm1756_vm1, %v988_v6, %v1789_v51  ;;  %v891_v9 = vadd.f32 %v273_v45, %v257_v2  ;;  %v1003_v10 = vadd.f32 %v305_v17, %v289_v41  ;;  %v433_v25 = vld [vmem:[%s3554_s23 + $0x6b8] sm:$0xff]  ;;  %v602_v41 = vld [vmem:[#allocation5 + $0x400] sm:$0xff]  ;;  %v603_v17 = vld [vmem:[#allocation5 + $0x408] sm:$0xff] }
  0xf3   : > { %v1434_v48 = vadd.f32 %v1433_v49, %v1432_v32  ;;  %v1791_v30 = vsel %vm1758_vm2, %v1100_v18, %v1790_v55  ;;  %2992 = vmatprep.subr.bf16.mxu0 %v2991_v52  ;;  %v780_v19 = vrot.slane %v779_v16, 4  ;;  %v1115_v20 = vadd.f32 %v337_v33, %v321_v36  ;;  %v449_v13 = vld [vmem:[%s3554_s23 + $0x738] sm:$0xff]  ;;  %v650_v36 = vld [vmem:[#allocation5 + $0x580] sm:$0xff]  ;;  %v651_v33 = vld [vmem:[#allocation5 + $0x588] sm:$0xff] }
  0xf4   : > { %v1546_v38 = vadd.f32 %v1545_v59, %v1544_v37  ;;  %v1792_v22 = vsel %vm1760_vm3, %v1212_v42, %v1791_v30  ;;  %v892_v54 = vrot.slane %v891_v9, 4  ;;  %v1004_v24 = vrot.slane %v1003_v10, 4  ;;  %v465_v15 = vld [vmem:[%s3554_s23 + $0x7b8] sm:$0xff]  ;;  %v240_v55 = vld [vmem:[%s3554_s23 + $0xb0] sm:$0xff] }
  0xf5   : > { %v1435_v12 = vrot.slane %v1434_v48, 1  ;;  %v1793_v8 = vsel %vm1762_vm4, %v1324_v58, %v1792_v22  ;;  %v781_v3 = vadd.f32 %v780_v19, %v779_v16  ;;  %v1116_v50 = vrot.slane %v1115_v20, 4 }
  0xf6   : > { %v1547_v34 = vrot.slane %v1546_v38, 1  ;;  %v893_v46 = vadd.f32 %v892_v54, %v891_v9  ;;  %v1005_v28 = vadd.f32 %v1004_v24, %v1003_v10  ;;  %v1227_v4 = vadd.f32 %v369_v11, %v353_v21  ;;  %v256_v21 = vld [vmem:[%s3554_s23 + $0x130] sm:$0xff] }
  0xf7   : > { %v1436_v44 = vadd.f32 %v1435_v12, %v1434_v48  ;;  %v782_v63 = vrot.slane %v781_v3, 2  ;;  %v1117_v0 = vadd.f32 %v1116_v50, %v1115_v20  ;;  %v1339_v26 = vadd.f32 %v401_v53, %v385_v23  ;;  %v224_v48 = vld [vmem:[%s3554_s23 + $0x30] sm:$0xff] }
  0xf8   : > { %v1548_v29 = vadd.f32 %v1547_v34, %v1546_v38  ;;  %v894_v39 = vrot.slane %v893_v46, 2  ;;  %v1006_v40 = vrot.slane %v1005_v28, 2  ;;  %v1228_v27 = vrot.slane %v1227_v4, 4  ;;  %v272_v11 = vld [vmem:[%s3554_s23 + $0x1b0] sm:$0xff] }
  0xf9   : > { %v1794_v1 = vsel %vm1764_vm5, %v1436_v44, %v1793_v8  ;;  %v783_v35 = vadd.f32 %v782_v63, %v781_v3  ;;  %v1118_v56 = vrot.slane %v1117_v0, 2  ;;  %v1340_v57 = vrot.slane %v1339_v26, 4  ;;  %v288_v23 = vld [vmem:[%s3554_s23 + $0x230] sm:$0xff] }
  0xfa   : > { %v1795_v61 = vsel %vm1766_vm6, %v1548_v29, %v1794_v1  ;;  %v895_v62 = vadd.f32 %v894_v39, %v893_v46  ;;  %v1007_v43 = vadd.f32 %v1006_v40, %v1005_v28  ;;  %v1229_v31 = vadd.f32 %v1228_v27, %v1227_v4  ;;  %v304_v53 = vld [vmem:[%s3554_s23 + $0x2b0] sm:$0xff] }
  0xfb   : > { %2094 = vmatmul.mubr.f32.vlgmr.msra.gmra.mrb[2].mxu0 %v1795_v61  ;;  %v1451_v32 = vadd.f32 %v433_v25, %v417_v47  ;;  %v784_v14 = vrot.slane %v783_v35, 1  ;;  %v1119_v7 = vadd.f32 %v1118_v56, %v1117_v0  ;;  %v1341_v2 = vadd.f32 %v1340_v57, %v1339_v26  ;;  %v320_v8 = vld [vmem:[%s3554_s23 + $0x330] sm:$0xff] }
  0xfc   : > { %v1563_v60 = vadd.f32 %v465_v15, %v449_v13  ;;  %v896_v5 = vrot.slane %v895_v62, 1  ;;  %v1008_v6 = vrot.slane %v1007_v43, 1  ;;  %v1230_v37 = vrot.slane %v1229_v31, 2  ;;  %v336_v3 = vld [vmem:[%s3554_s23 + $0x3b0] sm:$0xff] }
  0xfd   : > { %v1452_v45 = vrot.slane %v1451_v32, 4  ;;  %v785_v18 = vadd.f32 %v784_v14, %v783_v35  ;;  %v1120_v42 = vrot.slane %v1119_v7, 1  ;;  %v1342_v58 = vrot.slane %v1341_v2, 2  ;;  %v352_v25 = vld [vmem:[%s3554_s23 + $0x430] sm:$0xff] }
  0xfe   : > { %v1564_v49 = vrot.slane %v1563_v60, 4  ;;  %v897_v59 = vadd.f32 %v896_v5, %v895_v62  ;;  %v1009_v51 = vadd.f32 %v1008_v6, %v1007_v43  ;;  %v1231_v52 = vadd.f32 %v1230_v37, %v1229_v31  ;;  %v368_v63 = vld [vmem:[%s3554_s23 + $0x4b0] sm:$0xff] }
  0xff   : > { %v1453_v16 = vadd.f32 %v1452_v45, %v1451_v32  ;;  %v1121_v9 = vadd.f32 %v1120_v42, %v1119_v7  ;;  %v1343_v10 = vadd.f32 %v1342_v58, %v1341_v2  ;;  %v2993_v30 = vpack.c.bf16 %v603_v17, %v602_v41  ;;  %v384_v15 = vld [vmem:[%s3554_s23 + $0x530] sm:$0xff] }
 0x100   : > { %v1565_v38 = vadd.f32 %v1564_v49, %v1563_v60  ;;  %v1232_v19 = vrot.slane %v1231_v52, 1  ;;  %v1810_v12 = vsel %vm1754_vm0, %v897_v59, %v785_v18  ;;  %v3023_v22 = vpack.c.bf16 %v651_v33, %v650_v36  ;;  %v400_v39 = vld [vmem:[%s3554_s23 + $0x5b0] sm:$0xff] }
 0x101   : > { %v1454_v20 = vrot.slane %v1453_v16, 2  ;;  %v1344_v54 = vrot.slane %v1343_v10, 1  ;;  %v1811_v34 = vsel %vm1756_vm1, %v1009_v51, %v1810_v12  ;;  %2994 = vmatpush3.bf16.msra.mxu0 %v2993_v30  ;;  %v772_v50 = vadd.f32 %v240_v55, %v224_v48  ;;  %v416_v7 = vld [vmem:[%s3554_s23 + $0x630] sm:$0xff] }
 0x102   : > { %v1566_v24 = vrot.slane %v1565_v38, 2  ;;  %v1233_v44 = vadd.f32 %v1232_v19, %v1231_v52  ;;  %v1812_v28 = vsel %vm1758_vm2, %v1121_v9, %v1811_v34  ;;  %3024 = vmatprep.subr.bf16.mxu1 %v3023_v22  ;;  %v884_v4 = vadd.f32 %v272_v11, %v256_v21  ;;  %v432_v2 = vld [vmem:[%s3554_s23 + $0x6b0] sm:$0xff]  ;;  %v3999_v19 = vld [vmem:[#allocation5 + $0x500] sm:$0xff] }
 0x103   : > { %v1455_v46 = vadd.f32 %v1454_v20, %v1453_v16  ;;  %v1345_v29 = vadd.f32 %v1344_v54, %v1343_v10  ;;  %v773_v0 = vrot.slane %v772_v50, 4  ;;  %v996_v26 = vadd.f32 %v304_v53, %v288_v23  ;;  %v448_v45 = vld [vmem:[%s3554_s23 + $0x730] sm:$0xff]  ;;  %v4001_v20 = vld [vmem:[#allocation5 + $0x508] sm:$0xff] }
 0x104   : > { %v1567_v47 = vadd.f32 %v1566_v24, %v1565_v38  ;;  %v1813_v13 = vsel %vm1760_vm3, %v1233_v44, %v1812_v28  ;;  %v885_v40 = vrot.slane %v884_v4, 4  ;;  %v1108_v27 = vadd.f32 %v336_v3, %v320_v8  ;;  %v464_v41 = vld [vmem:[%s3554_s23 + $0x7b0] sm:$0xff]  ;;  %v621_v24 = vld [vmem:[#allocation5 + $0x498] sm:$0xff] }
 0x105   : > { %v1456_v1 = vrot.slane %v1455_v46, 1  ;;  %v1814_v35 = vsel %vm1762_vm4, %v1345_v29, %v1813_v13  ;;  %v774_v56 = vadd.f32 %v773_v0, %v772_v50  ;;  %v997_v57 = vrot.slane %v996_v26, 4  ;;  %v620_v12 = vld [vmem:[#allocation5 + $0x490] sm:$0xff]  ;;  %v605_v8 = vld [vmem:[#allocation5 + $0x418] sm:$0xff]  ;;  %v4015_v13 = vld [vmem:[#allocation5 + $0x4a8] sm:$0xff] }
 0x106   : > { %v1568_v61 = vrot.slane %v1567_v47, 1  ;;  %v886_v43 = vadd.f32 %v885_v40, %v884_v4  ;;  %v1109_v31 = vrot.slane %v1108_v27, 4  ;;  %v1220_v32 = vadd.f32 %v368_v63, %v352_v25  ;;  %v604_v34 = vld [vmem:[#allocation5 + $0x410] sm:$0xff]  ;;  %v4005_v4 = vld [vmem:[#allocation5 + $0x598] sm:$0xff] }
 0x107   : > { %v1457_v62 = vadd.f32 %v1456_v1, %v1455_v46  ;;  %v775_v60 = vrot.slane %v774_v56, 2  ;;  %v998_v5 = vadd.f32 %v997_v57, %v996_v26  ;;  %v1332_v6 = vadd.f32 %v400_v39, %v384_v15  ;;  %v4003_v28 = vld [vmem:[#allocation5 + $0x590] sm:$0xff]  ;;  %v4013_v1 = vld [vmem:[#allocation5 + $0x4a0] sm:$0xff]  ;;  %v4019_v39 = vld [vmem:[#allocation5 + $0x428] sm:$0xff] }
 0x108   : > { %v1569_v14 = vadd.f32 %v1568_v61, %v1567_v47  ;;  %v887_v17 = vrot.slane %v886_v43, 2  ;;  %v1110_v18 = vadd.f32 %v1109_v31, %v1108_v27  ;;  %v1221_v42 = vrot.slane %v1220_v32, 4  ;;  %v4007_v29 = vld [vmem:[#allocation5 + $0x510] sm:$0xff]  ;;  %v4009_v47 = vld [vmem:[#allocation5 + $0x518] sm:$0xff]  ;;  %v4017_v15 = vld [vmem:[#allocation5 + $0x420] sm:$0xff] }
 0x109   : > { %v1815_v37 = vsel %vm1764_vm5, %v1457_v62, %v1814_v35  ;;  %v776_v49 = vadd.f32 %v775_v60, %v774_v56  ;;  %v999_v36 = vrot.slane %v998_v5, 2  ;;  %v1333_v33 = vrot.slane %v1332_v6, 4  ;;  %v4022_v56 = vld [vmem:[#allocation5 + $0x5a0] sm:$0xff]  ;;  %v4024_v57 = vld [vmem:[#allocation5 + $0x5a8] sm:$0xff]  ;;  %v4033_v60 = vld [vmem:[#allocation5 + $0x4b8] sm:$0xff] }
 0x10a   : > { %v1816_v58 = vsel %vm1766_vm6, %v1569_v14, %v1815_v37  ;;  %v888_v59 = vadd.f32 %v887_v17, %v886_v43  ;;  %v1111_v51 = vrot.slane %v1110_v18, 2  ;;  %v1222_v52 = vadd.f32 %v1221_v42, %v1220_v32  ;;  %v4026_v62 = vld [vmem:[#allocation5 + $0x520] sm:$0xff]  ;;  %v4028_v43 = vld [vmem:[#allocation5 + $0x528] sm:$0xff]  ;;  %v4039_v37 = vld [vmem:[#allocation5 + $0x5b0] sm:$0xff] }
 0x10b   : > { %2163 = vmatprep.mubr.f32.mxu1 %v1816_v58  ;;  %v1444_v16 = vadd.f32 %v432_v2, %v416_v7  ;;  %v777_v48 = vrot.slane %v776_v49, 1  ;;  %v1000_v55 = vadd.f32 %v999_v36, %v998_v5  ;;  %v1334_v9 = vadd.f32 %v1333_v33, %v1332_v6  ;;  %v4031_v2 = vld [vmem:[#allocation5 + $0x4b0] sm:$0xff]  ;;  %v4037_v6 = vld [vmem:[#allocation5 + $0x438] sm:$0xff]  ;;  %v4048_v36 = vld [vmem:[#allocation5 + $0x4c0] sm:$0xff] }
 0x10c   : > { %v1556_v10 = vadd.f32 %v464_v41, %v448_v45  ;;  %v889_v38 = vrot.slane %v888_v59, 1  ;;  %v1112_v30 = vadd.f32 %v1111_v51, %v1110_v18  ;;  %v1223_v21 = vrot.slane %v1222_v52, 2  ;;  %v4035_v5 = vld [vmem:[#allocation5 + $0x430] sm:$0xff]  ;;  %v4041_v45 = vld [vmem:[#allocation5 + $0x5b8] sm:$0xff]  ;;  %v4050_v33 = vld [vmem:[#allocation5 + $0x4c8] sm:$0xff] }
 0x10d   : > { %v1445_v11 = vrot.slane %v1444_v16, 4  ;;  %v778_v22 = vadd.f32 %v777_v48, %v776_v49  ;;  %v1001_v23 = vrot.slane %v1000_v55, 1  ;;  %v1335_v53 = vrot.slane %v1334_v9, 2  ;;  %v4044_v58 = vld [vmem:[#allocation5 + $0x530] sm:$0xff]  ;;  %v4046_v49 = vld [vmem:[#allocation5 + $0x538] sm:$0xff]  ;;  %v4054_v51 = vld [vmem:[#allocation5 + $0x448] sm:$0xff] }
 0x10e   : > { %v1557_v54 = vrot.slane %v1556_v10, 4  ;;  %v890_v3 = vadd.f32 %v889_v38, %v888_v59  ;;  %v1113_v50 = vrot.slane %v1112_v30, 1  ;;  %v1224_v44 = vadd.f32 %v1223_v21, %v1222_v52  ;;  %v4052_v59 = vld [vmem:[#allocation5 + $0x440] sm:$0xff]  ;;  %v4068_v21 = vld [vmem:[#allocation5 + $0x4d0] sm:$0xff] }
 0x10f   : > { %v1446_v46 = vadd.f32 %v1445_v11, %v1444_v16  ;;  %v1002_v25 = vadd.f32 %v1001_v23, %v1000_v55  ;;  %v1336_v63 = vadd.f32 %v1335_v53, %v1334_v9  ;;  %v3025_v26 = vpack.c.bf16 %v4001_v20, %v3999_v19  ;;  %v4060_v9 = vld [vmem:[#allocation5 + $0x5c0] sm:$0xff]  ;;  %v4070_v11 = vld [vmem:[#allocation5 + $0x4d8] sm:$0xff]  ;;  %v291_v55 = vld [vmem:[%s3554_s23 + $0x248] sm:$0xff] }
 0x110   : > { %v1558_v0 = vadd.f32 %v1557_v54, %v1556_v10  ;;  %v1114_v40 = vadd.f32 %v1113_v50, %v1112_v30  ;;  %v1225_v27 = vrot.slane %v1224_v44, 1  ;;  %v1803_v35 = vsel %vm1754_vm0, %v890_v3, %v778_v22  ;;  %v4062_v10 = vld [vmem:[#allocation5 + $0x5c8] sm:$0xff]  ;;  %v4064_v38 = vld [vmem:[#allocation5 + $0x540] sm:$0xff]  ;;  %v4077_v54 = vld [vmem:[#allocation5 + $0x450] sm:$0xff] }
 0x111   : > { %v1447_v61 = vrot.slane %v1446_v46, 2  ;;  %v1337_v31 = vrot.slane %v1336_v63, 1  ;;  %v1804_v14 = vsel %vm1756_vm1, %v1002_v25, %v1803_v35  ;;  %v2995_v7 = vpack.c.bf16 %v621_v24, %v620_v12  ;;  %v4066_v30 = vld [vmem:[#allocation5 + $0x548] sm:$0xff]  ;;  %v4079_v24 = vld [vmem:[#allocation5 + $0x458] sm:$0xff]  ;;  %v4085_v3 = vld [vmem:[#allocation5 + $0x550] sm:$0xff] }
 0x112   : > { %v1559_v32 = vrot.slane %v1558_v0, 2  ;;  %v1226_v41 = vadd.f32 %v1225_v27, %v1224_v44  ;;  %v1805_v18 = vsel %vm1758_vm2, %v1114_v40, %v1804_v14  ;;  %v2997_v42 = vpack.c.bf16 %v605_v8, %v604_v34  ;;  %v4081_v34 = vld [vmem:[#allocation5 + $0x5d0] sm:$0xff]  ;;  %v4083_v8 = vld [vmem:[#allocation5 + $0x5d8] sm:$0xff]  ;;  %v4104_v40 = vld [vmem:[#allocation5 + $0x5e8] sm:$0xff] }
 0x113   : > { %v1448_v17 = vadd.f32 %v1447_v61, %v1446_v46  ;;  %v1338_v52 = vadd.f32 %v1337_v31, %v1336_v63  ;;  %2996 = vmatprep.subr.bf16.mxu0 %v2995_v7  ;;  %v2999_v23 = vpack.c.bf16 %v4015_v13, %v4013_v1  ;;  %v3001_v53 = vpack.c.bf16 %v4019_v39, %v4017_v15  ;;  %v4087_v50 = vld [vmem:[#allocation5 + $0x558] sm:$0xff]  ;;  %v4096_v1 = vld [vmem:[#allocation5 + $0x4e8] sm:$0xff]  ;;  %v4098_v13 = vld [vmem:[#allocation5 + $0x460] sm:$0xff] }
 0x114   : > { %v1560_v16 = vadd.f32 %v1559_v32, %v1558_v0  ;;  %v1806_v22 = vsel %vm1760_vm3, %v1226_v41, %v1805_v18  ;;  %2998 = vmatpush3.bf16.msra.mxu0 %v2997_v42  ;;  %v4094_v0 = vld [vmem:[#allocation5 + $0x4e0] sm:$0xff]  ;;  %v4100_v15 = vld [vmem:[#allocation5 + $0x468] sm:$0xff]  ;;  %v3003_v31 = vpack.c.bf16 %v4033_v60, %v4031_v2  ;;  %v3005_v32 = vpack.c.bf16 %v4037_v6, %v4035_v5  ;;  %v4116_v7 = vld [vmem:[#allocation5 + $0x4f0] sm:$0xff] }
 0x115   : > { %v1449_v12 = vrot.slane %v1448_v17, 1  ;;  %v1807_v46 = vsel %vm1762_vm4, %v1338_v52, %v1806_v22  ;;  %v4102_v39 = vld [vmem:[#allocation5 + $0x5e0] sm:$0xff]  ;;  %v4108_v61 = vld [vmem:[#allocation5 + $0x568] sm:$0xff]  ;;  %3000 = vmatprep.subr.bf16.mxu0 %v2999_v23  ;;  %v4118_v41 = vld [vmem:[#allocation5 + $0x4f8] sm:$0xff]  ;;  %v3009_v22 = vpack.c.bf16 %v4054_v51, %v4052_v59 }
 0x116   : > { %v1561_v44 = vrot.slane %v1560_v16, 1  ;;  %4725 = vst [vmem:[#allocation12_spill] sm:$0xff] %v4102_v39  ;;  %v4106_v27 = vld [vmem:[#allocation5 + $0x560] sm:$0xff]  ;;  %4727 = vst [vmem:[#allocation13_spill] sm:$0xff] %v4108_v61  ;;  %v4122_v18 = vld [vmem:[#allocation5 + $0x478] sm:$0xff] }
 0x117   : > { %4726 = vst [vmem:[#allocation14_spill] sm:$0xff] %v4106_v27  ;;  %v1450_v35 = vadd.f32 %v1449_v12, %v1448_v17  ;;  %v4120_v17 = vld [vmem:[#allocation5 + $0x470] sm:$0xff]  ;;  %v4126_v2 = vld [vmem:[#allocation5 + $0x5f8] sm:$0xff]  ;;  %v3007_v12 = vpack.c.bf16 %v4050_v33, %v4048_v36  ;;  %v227_v23 = vld [vmem:[%s3554_s23 + $0x48] sm:$0xff]  ;;  %v3011_v33 = vpack.c.bf16 %v4070_v11, %v4068_v21 }
 0x118   : > { %v4124_v42 = vld [vmem:[#allocation5 + $0x5f0] sm:$0xff]  ;;  %4729 = vst [vmem:[#allocation16_spill] sm:$0xff] %v4126_v2  ;;  %v4130_v5 = vld [vmem:[#allocation5 + $0x578] sm:$0xff]  ;;  %v1562_v6 = vadd.f32 %v1561_v44, %v1560_v16  ;;  %v243_v14 = vld [vmem:[%s3554_s23 + $0xc8] sm:$0xff]  ;;  %3002 = vmatpush3.bf16.msra.mxu0 %v3001_v53  ;;  %v3013_v53 = vpack.c.bf16 %v4079_v24, %v4077_v54  ;;  %v3015_v44 = vpack.c.bf16 %v4096_v1, %v4094_v0 }
 0x119   : > { %4728 = vst [vmem:[#allocation15_spill] sm:$0xff] %v4124_v42  ;;  %v4128_v60 = vld [vmem:[#allocation5 + $0x570] sm:$0xff]  ;;  %v259_v63 = vld [vmem:[%s3554_s23 + $0x148] sm:$0xff]  ;;  %v1808_v16 = vsel %vm1764_vm5, %v1450_v35, %v1807_v46  ;;  %3004 = vmatprep.subr.bf16.mxu0 %v3003_v31  ;;  %v4731_v31 = vpack.c.bf16 %v4005_v4, %v4003_v28  ;;  %v793_v19 = vadd.f32 %v243_v14, %v227_v23 }
 0x11a   : > { %4730 = vst [vmem:[#allocation17_spill] sm:$0xff] %v4128_v60  ;;  %v275_v25 = vld [vmem:[%s3554_s23 + $0x1c8] sm:$0xff]  ;;  %v1809_v48 = vsel %vm1766_vm6, %v1562_v6, %v1808_v16  ;;  %v4732_v54 = vpack.c.bf16 %v4009_v47, %v4007_v29 }
 0x11b   : > { %v307_v59 = vld [vmem:[%s3554_s23 + $0x2c8] sm:$0xff]  ;;  %2164 = vmatmul.mubr.f32.vlgmr.msra.gmra.mrb[2].mxu1 %v1809_v48  ;;  %v905_v20 = vadd.f32 %v275_v25, %v259_v63  ;;  %v794_v39 = vrot.slane %v793_v19, 4 }
 0x11c   : > { %v323_v51 = vld [vmem:[%s3554_s23 + $0x348] sm:$0xff]  ;;  %3026 = vmatpush3.bf16.msra.mxu1 %v3025_v26  ;;  %3006 = vmatpush3.bf16.msra.mxu0 %v3005_v32  ;;  %v1017_v26 = vadd.f32 %v307_v59, %v291_v55  ;;  %v4733_v55 = vpack.c.bf16 %v4024_v57, %v4022_v56 }
 0x11d   : > { %v339_v52 = vld [vmem:[%s3554_s23 + $0x3c8] sm:$0xff]  ;;  %3028 = vmatprep.subr.bf16.mxu1 %v4731_v31  ;;  %3008 = vmatprep.subr.bf16.mxu0 %v3007_v12  ;;  %v906_v1 = vrot.slane %v905_v20, 4  ;;  %v795_v25 = vadd.f32 %v794_v39, %v793_v19  ;;  %v242_v31 = vld [vmem:[%s3554_s23 + $0xc0] sm:$0xff] }
 0x11e   : > { %v355_v36 = vld [vmem:[%s3554_s23 + $0x448] sm:$0xff]  ;;  %v1129_v48 = vadd.f32 %v339_v52, %v323_v51  ;;  %v1018_v42 = vrot.slane %v1017_v26, 4 }
 0x11f   : > { %v371_v21 = vld [vmem:[%s3554_s23 + $0x4c8] sm:$0xff]  ;;  %v907_v63 = vadd.f32 %v906_v1, %v905_v20  ;;  %v796_v29 = vrot.slane %v795_v25, 2  ;;  %v306_v20 = vld [vmem:[%s3554_s23 + $0x2c0] sm:$0xff] }
 0x120   : > { %v387_v11 = vld [vmem:[%s3554_s23 + $0x548] sm:$0xff]  ;;  %v1241_v27 = vadd.f32 %v371_v21, %v355_v36  ;;  %3030 = vmatpush3.bf16.msra.mxu1 %v4732_v54  ;;  %v1130_v60 = vrot.slane %v1129_v48, 4  ;;  %3010 = vmatpush3.bf16.msra.mxu0 %v3009_v22  ;;  %v1019_v14 = vadd.f32 %v1018_v42, %v1017_v26  ;;  %v322_v26 = vld [vmem:[%s3554_s23 + $0x340] sm:$0xff] }
 0x121   : > { %v403_v6 = vld [vmem:[%s3554_s23 + $0x5c8] sm:$0xff]  ;;  %3032 = vmatprep.subr.bf16.mxu1 %v4733_v55  ;;  %3012 = vmatprep.subr.bf16.mxu0 %v3011_v33  ;;  %v908_v47 = vrot.slane %v907_v63, 2 }
 0x122   : > { %v419_v16 = vld [vmem:[%s3554_s23 + $0x648] sm:$0xff]  ;;  %v1353_v0 = vadd.f32 %v403_v6, %v387_v11  ;;  %v1242_v28 = vrot.slane %v1241_v27, 4  ;;  %v1131_v12 = vadd.f32 %v1130_v60, %v1129_v48  ;;  %v1020_v51 = vrot.slane %v1019_v14, 2  ;;  %v226_v11 = vld [vmem:[%s3554_s23 + $0x40] sm:$0xff] }
 0x123   : > { %v435_v35 = vld [vmem:[%s3554_s23 + $0x6c8] sm:$0xff]  ;;  %v4735_v60 = vpack.c.bf16 %v4041_v45, %v4039_v37  ;;  %v274_v6 = vld [vmem:[%s3554_s23 + $0x1c0] sm:$0xff] }
 0x124   : > { %v451_v24 = vld [vmem:[%s3554_s23 + $0x748] sm:$0xff]  ;;  %v1465_v61 = vadd.f32 %v435_v35, %v419_v16  ;;  %v1354_v4 = vrot.slane %v1353_v0, 4  ;;  %v1243_v23 = vadd.f32 %v1242_v28, %v1241_v27  ;;  %v4734_v35 = vpack.c.bf16 %v4028_v43, %v4026_v62  ;;  %3014 = vmatpush3.bf16.msra.mxu0 %v3013_v53  ;;  %v290_v16 = vld [vmem:[%s3554_s23 + $0x240] sm:$0xff] }
 0x125   : > { %v467_v46 = vld [vmem:[%s3554_s23 + $0x7c8] sm:$0xff]  ;;  %v1132_v56 = vrot.slane %v1131_v12, 2  ;;  %v797_v27 = vadd.f32 %v796_v29, %v795_v25  ;;  %3016 = vmatprep.subr.bf16.mxu0 %v3015_v44  ;;  %v4736_v44 = vpack.c.bf16 %v4046_v49, %v4044_v58  ;;  %v4737_v28 = vpack.c.bf16 %v4062_v10, %v4060_v9  ;;  %v338_v25 = vld [vmem:[%s3554_s23 + $0x3c0] sm:$0xff] }
 0x126   : > { %v1577_v2 = vadd.f32 %v467_v46, %v451_v24  ;;  %v1466_v32 = vrot.slane %v1465_v61, 4  ;;  %v1355_v36 = vadd.f32 %v1354_v4, %v1353_v0  ;;  %3034 = vmatpush3.bf16.msra.mxu1 %v4734_v35  ;;  %v1244_v57 = vrot.slane %v1243_v23, 2  ;;  %v258_v24 = vld [vmem:[%s3554_s23 + $0x140] sm:$0xff] }
 0x127   : > { %3036 = vmatprep.subr.bf16.mxu1 %v4735_v60  ;;  %v1133_v62 = vadd.f32 %v1132_v56, %v1131_v12  ;;  %v798_v54 = vrot.slane %v797_v27, 1  ;;  %v4738_v4 = vpack.c.bf16 %v4100_v15, %v4098_v13  ;;  %v786_v15 = vadd.f32 %v242_v31, %v226_v11  ;;  %v466_v11 = vld [vmem:[%s3554_s23 + $0x7c0] sm:$0xff] }
 0x128   : > { %v1578_v52 = vrot.slane %v1577_v2, 4  ;;  %v1467_v59 = vadd.f32 %v1466_v32, %v1465_v61  ;;  %v1356_v39 = vrot.slane %v1355_v36, 2  ;;  %v909_v61 = vadd.f32 %v908_v47, %v907_v63  ;;  %v354_v63 = vld [vmem:[%s3554_s23 + $0x440] sm:$0xff] }
 0x129   : > { %v1245_v43 = vadd.f32 %v1244_v57, %v1243_v23  ;;  %v1134_v48 = vrot.slane %v1133_v62, 1  ;;  %3018 = vmatpush3.bf16.msra.mxu0 %v4738_v4  ;;  %v799_v32 = vadd.f32 %v798_v54, %v797_v27  ;;  %v898_v47 = vadd.f32 %v274_v6, %v258_v24  ;;  %v4747_v4 = vld [vmem:[#allocation14_spill] sm:$0xff] }
 0x12a   : > { %v1579_v46 = vadd.f32 %v1578_v52, %v1577_v2  ;;  %v1468_v42 = vrot.slane %v1467_v59, 2  ;;  %v1021_v2 = vadd.f32 %v1020_v51, %v1019_v14  ;;  %v1357_v33 = vadd.f32 %v1356_v39, %v1355_v36  ;;  %3038 = vmatpush3.bf16.msra.mxu1 %v4736_v44  ;;  %v370_v14 = vld [vmem:[%s3554_s23 + $0x4c0] sm:$0xff] }
 0x12b   : > { %v910_v37 = vrot.slane %v909_v61, 1  ;;  %v1246_v0 = vrot.slane %v1245_v43, 1  ;;  %3040 = vmatprep.subr.bf16.mxu1 %v4737_v28  ;;  %v4739_v52 = vpack.c.bf16 %v4118_v41, %v4116_v7  ;;  %v1135_v12 = vadd.f32 %v1134_v48, %v1133_v62  ;;  %v386_v36 = vld [vmem:[%s3554_s23 + $0x540] sm:$0xff] }
 0x12c   : > { %v1580_v22 = vrot.slane %v1579_v46, 2  ;;  %v1469_v21 = vadd.f32 %v1468_v42, %v1467_v59  ;;  %v1022_v45 = vrot.slane %v1021_v2, 1  ;;  %v1358_v1 = vrot.slane %v1357_v33, 1  ;;  %v402_v59 = vld [vmem:[%s3554_s23 + $0x5c0] sm:$0xff] }
 0x12d   : > { %v911_v58 = vadd.f32 %v910_v37, %v909_v61  ;;  %3020 = vmatprep.subr.bf16.mxu0 %v4739_v52  ;;  %v1247_v23 = vadd.f32 %v1246_v0, %v1245_v43  ;;  %v4740_v51 = vpack.c.bf16 %v4066_v30, %v4064_v38  ;;  %v1010_v7 = vadd.f32 %v306_v20, %v290_v16  ;;  %v4746_v28 = vld [vmem:[#allocation13_spill] sm:$0xff] }
 0x12e   : > { %v1581_v53 = vadd.f32 %v1580_v22, %v1579_v46  ;;  %v1470_v19 = vrot.slane %v1469_v21, 1  ;;  %v1023_v49 = vadd.f32 %v1022_v45, %v1021_v2  ;;  %v1359_v9 = vadd.f32 %v1358_v1, %v1357_v33  ;;  %v4744_v45 = vld [vmem:[#allocation12_spill] sm:$0xff] }
 0x12f   : > { %v1824_v13 = vsel %vm1754_vm0, %v911_v58, %v799_v32  ;;  %3042 = vmatpush3.bf16.msra.mxu1 %v4740_v51  ;;  %v1122_v41 = vadd.f32 %v338_v25, %v322_v26  ;;  %v1234_v35 = vadd.f32 %v370_v14, %v354_v63  ;;  %v4741_v56 = vpack.c.bf16 %v4083_v8, %v4081_v34  ;;  %v418_v34 = vld [vmem:[%s3554_s23 + $0x640] sm:$0xff]  ;;  %v4749_v25 = vld [vmem:[#allocation16_spill] sm:$0xff]  ;;  %v4750_v63 = vld [vmem:[#allocation15_spill] sm:$0xff] }
 0x130   : > { %v1582_v55 = vrot.slane %v1581_v53, 1  ;;  %v1471_v10 = vadd.f32 %v1470_v19, %v1469_v21  ;;  %v1825_v46 = vsel %vm1756_vm1, %v1023_v49, %v1824_v13  ;;  %v4742_v57 = vpack.c.bf16 %v4122_v18, %v4120_v17  ;;  %v434_v8 = vld [vmem:[%s3554_s23 + $0x6c0] sm:$0xff]  ;;  %v245_v51 = vld [vmem:[%s3554_s23 + $0xd8] sm:$0xff] }
 0x131   : > { %3044 = vmatprep.subr.bf16.mxu1 %v4741_v56  ;;  %v1826_v39 = vsel %vm1758_vm2, %v1135_v12, %v1825_v46  ;;  %v787_v38 = vrot.slane %v786_v15, 4  ;;  %v899_v30 = vrot.slane %v898_v47, 4  ;;  %v1346_v42 = vadd.f32 %v402_v59, %v386_v36  ;;  %v450_v21 = vld [vmem:[%s3554_s23 + $0x740] sm:$0xff]  ;;  %v261_v56 = vld [vmem:[%s3554_s23 + $0x158] sm:$0xff] }
 0x132   : > { %v1583_v29 = vadd.f32 %v1582_v55, %v1581_v53  ;;  %3022 = vmatpush3.bf16.msra.mxu0 %v4742_v57  ;;  %v1827_v60 = vsel %vm1760_vm3, %v1247_v23, %v1826_v39  ;;  %v1011_v27 = vrot.slane %v1010_v7, 4  ;;  %v1123_v61 = vrot.slane %v1122_v41, 4  ;;  %v277_v57 = vld [vmem:[%s3554_s23 + $0x1d8] sm:$0xff] }
 0x133   : > { %v1235_v2 = vrot.slane %v1234_v35, 4  ;;  %v1828_v22 = vsel %vm1762_vm4, %v1359_v9, %v1827_v60  ;;  %v788_v62 = vadd.f32 %v787_v38, %v786_v15  ;;  %v900_v43 = vadd.f32 %v899_v30, %v898_v47  ;;  %v683_v15 = vld [vmem:[#allocation5 + $0x688] sm:$0xff]  ;;  %v229_v47 = vld [vmem:[%s3554_s23 + $0x58] sm:$0xff] }
 0x134   : > { %v1347_v17 = vrot.slane %v1346_v42, 4  ;;  %v4743_v18 = vpack.c.bf16 %v4087_v50, %v4085_v3  ;;  %v1829_v33 = vsel %vm1764_vm5, %v1471_v10, %v1828_v22  ;;  %v1012_v31 = vadd.f32 %v1011_v27, %v1010_v7  ;;  %v682_v10 = vld [vmem:[#allocation5 + $0x680] sm:$0xff]  ;;  %v293_v39 = vld [vmem:[%s3554_s23 + $0x258] sm:$0xff] }
 0x135   : > { %v1124_v54 = vadd.f32 %v1123_v61, %v1122_v41  ;;  %v1236_v37 = vadd.f32 %v1235_v2, %v1234_v35  ;;  %v4745_v53 = vpack.c.bf16 %v4104_v40, %v4744_v45  ;;  %v1830_v24 = vsel %vm1766_vm6, %v1583_v29, %v1829_v33  ;;  %v4752_v38 = vld [vmem:[#allocation17_spill] sm:$0xff] }
 0x136   : > { %3046 = vmatpush3.bf16.msra.mxu1 %v4743_v18  ;;  %v789_v6 = vrot.slane %v788_v62, 2  ;;  %v901_v16 = vrot.slane %v900_v43, 2  ;;  %v1348_v44 = vadd.f32 %v1347_v17, %v1346_v42  ;;  %2233 = vmatprep.mubr.f32.mxu0 %v1830_v24  ;;  %v1013_v48 = vrot.slane %v1012_v31, 2  ;;  %v309_v2 = vld [vmem:[%s3554_s23 + $0x2d8] sm:$0xff] }
 0x137   : > { %3048 = vmatprep.subr.bf16.mxu1 %v4745_v53  ;;  %v1125_v3 = vrot.slane %v1124_v54, 2  ;;  %v1237_v50 = vrot.slane %v1236_v37, 2  ;;  %v1458_v0 = vadd.f32 %v434_v8, %v418_v34  ;;  %v1570_v26 = vadd.f32 %v466_v11, %v450_v21  ;;  %v325_v22 = vld [vmem:[%s3554_s23 + $0x358] sm:$0xff] }
 0x138   : > { %v790_v1 = vadd.f32 %v789_v6, %v788_v62  ;;  %v902_v19 = vadd.f32 %v901_v16, %v900_v43  ;;  %v1349_v20 = vrot.slane %v1348_v44, 2  ;;  %v4748_v32 = vpack.c.bf16 %v4746_v28, %v4747_v4  ;;  %v341_v34 = vld [vmem:[%s3554_s23 + $0x3d8] sm:$0xff] }
 0x139   : > { %v1014_v40 = vadd.f32 %v1013_v48, %v1012_v31  ;;  %v1126_v58 = vadd.f32 %v1125_v3, %v1124_v54  ;;  %v1238_v49 = vadd.f32 %v1237_v50, %v1236_v37  ;;  %v1459_v55 = vrot.slane %v1458_v0, 4  ;;  %v357_v54 = vld [vmem:[%s3554_s23 + $0x458] sm:$0xff] }
 0x13a   : > { %3050 = vmatpush3.bf16.msra.mxu1 %v4748_v32  ;;  %v4751_v14 = vpack.c.bf16 %v4749_v25, %v4750_v63  ;;  %v791_v52 = vrot.slane %v790_v1, 1  ;;  %v903_v12 = vrot.slane %v902_v19, 1  ;;  %v1350_v23 = vadd.f32 %v1349_v20, %v1348_v44  ;;  %v373_v37 = vld [vmem:[%s3554_s23 + $0x4d8] sm:$0xff] }
 0x13b   : > { %v1571_v9 = vrot.slane %v1570_v26, 4  ;;  %v1015_v36 = vrot.slane %v1014_v40, 1  ;;  %v1127_v59 = vrot.slane %v1126_v58, 1  ;;  %v1239_v29 = vrot.slane %v1238_v49, 1  ;;  %v389_v16 = vld [vmem:[%s3554_s23 + $0x558] sm:$0xff] }
 0x13c   : > { %3052 = vmatprep.subr.bf16.mxu1 %v4751_v14  ;;  %v1460_v13 = vadd.f32 %v1459_v55, %v1458_v0  ;;  %v792_v46 = vadd.f32 %v791_v52, %v790_v1  ;;  %v904_v7 = vadd.f32 %v903_v12, %v902_v19  ;;  %v1351_v41 = vrot.slane %v1350_v23, 1  ;;  %v405_v44 = vld [vmem:[%s3554_s23 + $0x5d8] sm:$0xff] }
 0x13d   : > { %v1572_v35 = vadd.f32 %v1571_v9, %v1570_v26  ;;  %v4753_v30 = vpack.c.bf16 %v4130_v5, %v4752_v38  ;;  %v1016_v42 = vadd.f32 %v1015_v36, %v1014_v40  ;;  %v1128_v60 = vadd.f32 %v1127_v59, %v1126_v58  ;;  %v421_v40 = vld [vmem:[%s3554_s23 + $0x658] sm:$0xff] }
 0x13e   : > { %v1240_v27 = vadd.f32 %v1239_v29, %v1238_v49  ;;  %v1461_v61 = vrot.slane %v1460_v13, 2  ;;  %v1352_v8 = vadd.f32 %v1351_v41, %v1350_v23  ;;  %v1817_v43 = vsel %vm1754_vm0, %v904_v7, %v792_v46  ;;  %v437_v58 = vld [vmem:[%s3554_s23 + $0x6d8] sm:$0xff] }
 0x13f   : > { %3054 = vmatpush3.bf16.msra.mxu1 %v4753_v30  ;;  %v1573_v62 = vrot.slane %v1572_v35, 2  ;;  %v3055_v17 = vpack.c.bf16 %v683_v15, %v682_v10  ;;  %v1818_v5 = vsel %vm1756_vm1, %v1016_v42, %v1817_v43  ;;  %v807_v33 = vadd.f32 %v245_v51, %v229_v47  ;;  %v453_v14 = vld [vmem:[%s3554_s23 + $0x758] sm:$0xff]  ;;  %v714_v43 = vld [vmem:[#allocation5 + $0x780] sm:$0xff] }
 0x140   : > { %v1462_v18 = vadd.f32 %v1461_v61, %v1460_v13  ;;  %v919_v21 = vadd.f32 %v277_v57, %v261_v56  ;;  %v1819_v31 = vsel %vm1758_vm2, %v1128_v60, %v1818_v5  ;;  %v1031_v45 = vadd.f32 %v309_v2, %v293_v39  ;;  %v469_v52 = vld [vmem:[%s3554_s23 + $0x7d8] sm:$0xff]  ;;  %v666_v61 = vld [vmem:[#allocation5 + $0x600] sm:$0xff]  ;;  %v667_v2 = vld [vmem:[#allocation5 + $0x608] sm:$0xff] }
 0x141   : > { %v1574_v11 = vadd.f32 %v1573_v62, %v1572_v35  ;;  %3056 = vmatprep.subr.bf16.mxu0 %v3055_v17  ;;  %v1143_v53 = vadd.f32 %v341_v34, %v325_v22  ;;  %v1820_v6 = vsel %vm1760_vm3, %v1240_v27, %v1819_v31  ;;  %v808_v48 = vrot.slane %v807_v33, 4  ;;  %v715_v17 = vld [vmem:[#allocation5 + $0x788] sm:$0xff]  ;;  %v244_v31 = vld [vmem:[%s3554_s23 + $0xd0] sm:$0xff] }
 0x142   : > { %v1463_v24 = vrot.slane %v1462_v18, 1  ;;  %v920_v3 = vrot.slane %v919_v21, 4  ;;  %v1821_v0 = vsel %vm1762_vm4, %v1352_v8, %v1820_v6  ;;  %v1032_v1 = vrot.slane %v1031_v45, 4  ;;  %v276_v6 = vld [vmem:[%s3554_s23 + $0x1d0] sm:$0xff] }
 0x143   : > { %v1575_v50 = vrot.slane %v1574_v11, 1  ;;  %v1144_v19 = vrot.slane %v1143_v53, 4  ;;  %v809_v26 = vadd.f32 %v808_v48, %v807_v33  ;;  %v1255_v4 = vadd.f32 %v373_v37, %v357_v54  ;;  %v260_v54 = vld [vmem:[%s3554_s23 + $0x150] sm:$0xff] }
 0x144   : > { %v1464_v20 = vadd.f32 %v1463_v24, %v1462_v18  ;;  %v921_v28 = vadd.f32 %v920_v3, %v919_v21  ;;  %v1033_v49 = vadd.f32 %v1032_v1, %v1031_v45  ;;  %v1367_v25 = vadd.f32 %v405_v44, %v389_v16  ;;  %v292_v16 = vld [vmem:[%s3554_s23 + $0x250] sm:$0xff] }
 0x145   : > { %v1576_v32 = vadd.f32 %v1575_v50, %v1574_v11  ;;  %v1145_v55 = vadd.f32 %v1144_v19, %v1143_v53  ;;  %v810_v12 = vrot.slane %v809_v26, 2  ;;  %v1256_v9 = vrot.slane %v1255_v4, 4  ;;  %v228_v11 = vld [vmem:[%s3554_s23 + $0x50] sm:$0xff] }
 0x146   : > { %v1822_v63 = vsel %vm1764_vm5, %v1464_v20, %v1821_v0  ;;  %v922_v23 = vrot.slane %v921_v28, 2  ;;  %v1034_v36 = vrot.slane %v1033_v49, 2  ;;  %v1368_v29 = vrot.slane %v1367_v25, 4  ;;  %v308_v44 = vld [vmem:[%s3554_s23 + $0x2d0] sm:$0xff] }
 0x147   : > { %v1823_v10 = vsel %vm1766_vm6, %v1576_v32, %v1822_v63  ;;  %v1146_v59 = vrot.slane %v1145_v55, 2  ;;  %v811_v13 = vadd.f32 %v810_v12, %v809_v26  ;;  %v1257_v47 = vadd.f32 %v1256_v9, %v1255_v4  ;;  %v324_v1 = vld [vmem:[%s3554_s23 + $0x350] sm:$0xff] }
 0x148   : > { %2234 = vmatmul.mubr.f32.vlgmr.msra.gmra.mrb[4].mxu0 %v1823_v10  ;;  %v923_v15 = vadd.f32 %v922_v23, %v921_v28  ;;  %v1479_v51 = vadd.f32 %v437_v58, %v421_v40  ;;  %v1035_v46 = vadd.f32 %v1034_v36, %v1033_v49  ;;  %v1369_v41 = vadd.f32 %v1368_v29, %v1367_v25  ;;  %v340_v19 = vld [vmem:[%s3554_s23 + $0x3d0] sm:$0xff] }
 0x149   : > { %v1147_v7 = vadd.f32 %v1146_v59, %v1145_v55  ;;  %v1591_v35 = vadd.f32 %v469_v52, %v453_v14  ;;  %v812_v56 = vrot.slane %v811_v13, 1  ;;  %v1258_v39 = vrot.slane %v1257_v47, 2  ;;  %v356_v58 = vld [vmem:[%s3554_s23 + $0x450] sm:$0xff] }
 0x14a   : > { %v924_v57 = vrot.slane %v923_v15, 1  ;;  %v1480_v38 = vrot.slane %v1479_v51, 4  ;;  %v1036_v30 = vrot.slane %v1035_v46, 1  ;;  %v1370_v60 = vrot.slane %v1369_v41, 2  ;;  %v372_v49 = vld [vmem:[%s3554_s23 + $0x4d0] sm:$0xff] }
 0x14b   : > { %v1148_v42 = vrot.slane %v1147_v7, 1  ;;  %v1592_v27 = vrot.slane %v1591_v35, 4  ;;  %v813_v22 = vadd.f32 %v812_v56, %v811_v13  ;;  %v1259_v8 = vadd.f32 %v1258_v39, %v1257_v47  ;;  %v388_v52 = vld [vmem:[%s3554_s23 + $0x550] sm:$0xff] }
 0x14c   : > { %v925_v34 = vadd.f32 %v924_v57, %v923_v15  ;;  %v1481_v62 = vadd.f32 %v1480_v38, %v1479_v51  ;;  %v1037_v18 = vadd.f32 %v1036_v30, %v1035_v46  ;;  %v1371_v33 = vadd.f32 %v1370_v60, %v1369_v41  ;;  %v404_v12 = vld [vmem:[%s3554_s23 + $0x5d0] sm:$0xff] }
 0x14d   : > { %v1149_v5 = vadd.f32 %v1148_v42, %v1147_v7  ;;  %v1593_v21 = vadd.f32 %v1592_v27, %v1591_v35  ;;  %v1260_v37 = vrot.slane %v1259_v8, 1  ;;  %v3057_v24 = vpack.c.bf16 %v667_v2, %v666_v61  ;;  %v420_v7 = vld [vmem:[%s3554_s23 + $0x650] sm:$0xff] }
 0x14e   : > { %v1482_v45 = vrot.slane %v1481_v62, 2  ;;  %v1838_v53 = vsel %vm1754_vm0, %v925_v34, %v813_v22  ;;  %v1372_v48 = vrot.slane %v1371_v33, 1  ;;  %v3087_v0 = vpack.c.bf16 %v715_v17, %v714_v43  ;;  %v436_v41 = vld [vmem:[%s3554_s23 + $0x6d0] sm:$0xff] }
 0x14f   : > { %v1594_v3 = vrot.slane %v1593_v21, 2  ;;  %v1839_v50 = vsel %vm1756_vm1, %v1037_v18, %v1838_v53  ;;  %v1261_v20 = vadd.f32 %v1260_v37, %v1259_v8  ;;  %3058 = vmatpush3.bf16.msra.mxu0 %v3057_v24  ;;  %v800_v4 = vadd.f32 %v244_v31, %v228_v11  ;;  %v452_v38 = vld [vmem:[%s3554_s23 + $0x750] sm:$0xff]  ;;  %v4309_v53 = vld [vmem:[#allocation5 + $0x708] sm:$0xff] }
 0x150   : > { %v1483_v26 = vadd.f32 %v1482_v45, %v1481_v62  ;;  %v1840_v28 = vsel %vm1758_vm2, %v1149_v5, %v1839_v50  ;;  %v1373_v32 = vadd.f32 %v1372_v48, %v1371_v33  ;;  %3088 = vmatprep.subr.bf16.mxu1 %v3087_v0  ;;  %v912_v55 = vadd.f32 %v276_v6, %v260_v54  ;;  %v468_v30 = vld [vmem:[%s3554_s23 + $0x7d0] sm:$0xff]  ;;  %v4307_v45 = vld [vmem:[#allocation5 + $0x700] sm:$0xff] }
 0x151   : > { %v1595_v40 = vadd.f32 %v1594_v3, %v1593_v21  ;;  %v1024_v25 = vadd.f32 %v308_v44, %v292_v16  ;;  %v1841_v14 = vsel %vm1760_vm3, %v1261_v20, %v1840_v28  ;;  %v801_v23 = vrot.slane %v800_v4, 4  ;;  %v684_v24 = vld [vmem:[#allocation5 + $0x690] sm:$0xff]  ;;  %v685_v3 = vld [vmem:[#allocation5 + $0x698] sm:$0xff] }
 0x152   : > { %v1484_v63 = vrot.slane %v1483_v26, 1  ;;  %v1136_v9 = vadd.f32 %v340_v19, %v324_v1  ;;  %v1842_v36 = vsel %vm1762_vm4, %v1373_v32, %v1841_v14  ;;  %v913_v59 = vrot.slane %v912_v55, 4  ;;  %v668_v50 = vld [vmem:[#allocation5 + $0x610] sm:$0xff]  ;;  %v4321_v14 = vld [vmem:[#allocation5 + $0x6a8] sm:$0xff] }
 0x153   : > { %v1596_v10 = vrot.slane %v1595_v40, 1  ;;  %v1025_v29 = vrot.slane %v1024_v25, 4  ;;  %v802_v15 = vadd.f32 %v801_v23, %v800_v4  ;;  %v1248_v51 = vadd.f32 %v372_v49, %v356_v58  ;;  %v4311_v28 = vld [vmem:[#allocation5 + $0x790] sm:$0xff]  ;;  %v4313_v4 = vld [vmem:[#allocation5 + $0x798] sm:$0xff] }
 0x154   : > { %v1485_v13 = vadd.f32 %v1484_v63, %v1483_v26  ;;  %v1137_v47 = vrot.slane %v1136_v9, 4  ;;  %v914_v35 = vadd.f32 %v913_v59, %v912_v55  ;;  %v1360_v57 = vadd.f32 %v404_v12, %v388_v52  ;;  %v669_v26 = vld [vmem:[#allocation5 + $0x618] sm:$0xff]  ;;  %v4315_v55 = vld [vmem:[#allocation5 + $0x710] sm:$0xff]  ;;  %v4319_v63 = vld [vmem:[#allocation5 + $0x6a0] sm:$0xff] }
 0x155   : > { %v1597_v46 = vadd.f32 %v1596_v10, %v1595_v40  ;;  %v1026_v56 = vadd.f32 %v1025_v29, %v1024_v25  ;;  %v803_v42 = vrot.slane %v802_v15, 2  ;;  %v1249_v27 = vrot.slane %v1248_v51, 4  ;;  %v4317_v25 = vld [vmem:[#allocation5 + $0x718] sm:$0xff]  ;;  %v4325_v10 = vld [vmem:[#allocation5 + $0x620] sm:$0xff]  ;;  %v4331_v29 = vld [vmem:[#allocation5 + $0x7a8] sm:$0xff] }
 0x156   : > { %v1843_v39 = vsel %vm1764_vm5, %v1485_v13, %v1842_v36  ;;  %v1138_v60 = vadd.f32 %v1137_v47, %v1136_v9  ;;  %v915_v2 = vrot.slane %v914_v35, 2  ;;  %v1361_v34 = vrot.slane %v1360_v57, 4  ;;  %v4327_v36 = vld [vmem:[#allocation5 + $0x628] sm:$0xff]  ;;  %v4329_v59 = vld [vmem:[#allocation5 + $0x7a0] sm:$0xff] }
 0x157   : > { %v1844_v61 = vsel %vm1766_vm6, %v1597_v46, %v1843_v39  ;;  %v1027_v22 = vrot.slane %v1026_v56, 2  ;;  %v804_v8 = vadd.f32 %v803_v42, %v802_v15  ;;  %v1250_v43 = vadd.f32 %v1249_v27, %v1248_v51  ;;  %v4334_v46 = vld [vmem:[#allocation5 + $0x720] sm:$0xff]  ;;  %v4349_v27 = vld [vmem:[#allocation5 + $0x7b8] sm:$0xff] }
 0x158   : > { %2303 = vmatprep.mubr.f32.mxu1 %v1844_v61  ;;  %v1139_v62 = vrot.slane %v1138_v60, 2  ;;  %v1472_v17 = vadd.f32 %v436_v41, %v420_v7  ;;  %v916_v18 = vadd.f32 %v915_v2, %v914_v35  ;;  %v1362_v33 = vadd.f32 %v1361_v34, %v1360_v57  ;;  %v4336_v7 = vld [vmem:[#allocation5 + $0x728] sm:$0xff]  ;;  %v4338_v41 = vld [vmem:[#allocation5 + $0x6b0] sm:$0xff]  ;;  %v4340_v35 = vld [vmem:[#allocation5 + $0x6b8] sm:$0xff] }
 0x159   : > { %v1028_v5 = vadd.f32 %v1027_v22, %v1026_v56  ;;  %v1584_v21 = vadd.f32 %v468_v30, %v452_v38  ;;  %v805_v11 = vrot.slane %v804_v8, 1  ;;  %v1251_v54 = vrot.slane %v1250_v43, 2  ;;  %v4342_v56 = vld [vmem:[#allocation5 + $0x630] sm:$0xff]  ;;  %v4344_v57 = vld [vmem:[#allocation5 + $0x638] sm:$0xff]  ;;  %v4355_v22 = vld [vmem:[#allocation5 + $0x6c0] sm:$0xff] }
 0x15a   : > { %v1140_v31 = vadd.f32 %v1139_v62, %v1138_v60  ;;  %v1473_v37 = vrot.slane %v1472_v17, 4  ;;  %v917_v6 = vrot.slane %v916_v18, 1  ;;  %v1363_v44 = vrot.slane %v1362_v33, 2  ;;  %v4347_v60 = vld [vmem:[#allocation5 + $0x7b0] sm:$0xff]  ;;  %v4353_v2 = vld [vmem:[#allocation5 + $0x738] sm:$0xff]  ;;  %v4357_v34 = vld [vmem:[#allocation5 + $0x6c8] sm:$0xff] }
 0x15b   : > { %v1029_v16 = vrot.slane %v1028_v5, 1  ;;  %v1585_v48 = vrot.slane %v1584_v21, 4  ;;  %v806_v0 = vadd.f32 %v805_v11, %v804_v8  ;;  %v1252_v19 = vadd.f32 %v1251_v54, %v1250_v43  ;;  %v4351_v61 = vld [vmem:[#allocation5 + $0x730] sm:$0xff]  ;;  %v4370_v11 = vld [vmem:[#allocation5 + $0x740] sm:$0xff] }
 0x15c   : > { %v1141_v1 = vrot.slane %v1140_v31, 1  ;;  %v1474_v20 = vadd.f32 %v1473_v37, %v1472_v17  ;;  %v918_v32 = vadd.f32 %v917_v6, %v916_v18  ;;  %v1364_v58 = vadd.f32 %v1363_v44, %v1362_v33  ;;  %v4362_v18 = vld [vmem:[#allocation5 + $0x640] sm:$0xff]  ;;  %v4381_v44 = vld [vmem:[#allocation5 + $0x6d8] sm:$0xff] }
 0x15d   : > { %v1030_v40 = vadd.f32 %v1029_v16, %v1028_v5  ;;  %v1586_v49 = vadd.f32 %v1585_v48, %v1584_v21  ;;  %v1253_v12 = vrot.slane %v1252_v19, 1  ;;  %v3089_v9 = vpack.c.bf16 %v4309_v53, %v4307_v45  ;;  %v4364_v5 = vld [vmem:[#allocation5 + $0x648] sm:$0xff]  ;;  %v4366_v33 = vld [vmem:[#allocation5 + $0x7c0] sm:$0xff]  ;;  %v4379_v16 = vld [vmem:[#allocation5 + $0x6d0] sm:$0xff] }
 0x15e   : > { %v1142_v52 = vadd.f32 %v1141_v1, %v1140_v31  ;;  %v1475_v23 = vrot.slane %v1474_v20, 2  ;;  %v1365_v13 = vrot.slane %v1364_v58, 1  ;;  %v1831_v47 = vsel %vm1754_vm0, %v918_v32, %v806_v0  ;;  %v4368_v21 = vld [vmem:[#allocation5 + $0x7c8] sm:$0xff]  ;;  %v4383_v48 = vld [vmem:[#allocation5 + $0x650] sm:$0xff]  ;;  %v4389_v0 = vld [vmem:[#allocation5 + $0x7d8] sm:$0xff] }
 0x15f   : > { %v1587_v15 = vrot.slane %v1586_v49, 2  ;;  %v3059_v51 = vpack.c.bf16 %v685_v3, %v684_v24  ;;  %v1254_v39 = vadd.f32 %v1253_v12, %v1252_v19  ;;  %v1832_v30 = vsel %vm1756_vm1, %v1030_v40, %v1831_v47  ;;  %v4372_v31 = vld [vmem:[#allocation5 + $0x748] sm:$0xff]  ;;  %v4385_v3 = vld [vmem:[#allocation5 + $0x658] sm:$0xff]  ;;  %v4396_v32 = vld [vmem:[#allocation5 + $0x750] sm:$0xff] }
 0x160   : > { %v1476_v38 = vadd.f32 %v1475_v23, %v1474_v20  ;;  %v3061_v42 = vpack.c.bf16 %v669_v26, %v668_v50  ;;  %v1366_v8 = vadd.f32 %v1365_v13, %v1364_v58  ;;  %v1833_v43 = vsel %vm1758_vm2, %v1142_v52, %v1832_v30  ;;  %v4387_v50 = vld [vmem:[#allocation5 + $0x7d0] sm:$0xff]  ;;  %v4398_v40 = vld [vmem:[#allocation5 + $0x758] sm:$0xff]  ;;  %v4400_v58 = vld [vmem:[#allocation5 + $0x6e0] sm:$0xff] }
 0x161   : > { %v1588_v62 = vadd.f32 %v1587_v15, %v1586_v49  ;;  %3060 = vmatprep.subr.bf16.mxu0 %v3059_v51  ;;  %v1834_v37 = vsel %vm1760_vm3, %v1254_v39, %v1833_v43  ;;  %v3063_v6 = vpack.c.bf16 %v4321_v14, %v4319_v63  ;;  %v3065_v20 = vpack.c.bf16 %v4327_v36, %v4325_v10  ;;  %v4402_v49 = vld [vmem:[#allocation5 + $0x6e8] sm:$0xff]  ;;  %v4404_v63 = vld [vmem:[#allocation5 + $0x660] sm:$0xff]  ;;  %v4422_v51 = vld [vmem:[#allocation5 + $0x6f0] sm:$0xff] }
 0x162   : > { %v1477_v54 = vrot.slane %v1476_v38, 1  ;;  %3062 = vmatpush3.bf16.msra.mxu0 %v3061_v42  ;;  %v1835_v19 = vsel %vm1762_vm4, %v1366_v8, %v1834_v37  ;;  %v4406_v14 = vld [vmem:[#allocation5 + $0x668] sm:$0xff]  ;;  %v4408_v52 = vld [vmem:[#allocation5 + $0x7e0] sm:$0xff]  ;;  %v3067_v36 = vpack.c.bf16 %v4340_v35, %v4338_v41  ;;  %v3069_v13 = vpack.c.bf16 %v4344_v57, %v4342_v56  ;;  %v4424_v39 = vld [vmem:[#allocation5 + $0x6f8] sm:$0xff] }
 0x163   : > { %v1589_v1 = vrot.slane %v1588_v62, 1  ;;  %4754 = vst [vmem:[#allocation12_spill] sm:$0xff] %v4408_v52  ;;  %v4410_v12 = vld [vmem:[#allocation5 + $0x7e8] sm:$0xff]  ;;  %3064 = vmatprep.subr.bf16.mxu0 %v3063_v6  ;;  %v4418_v15 = vld [vmem:[#allocation5 + $0x760] sm:$0xff]  ;;  %v4428_v30 = vld [vmem:[#allocation5 + $0x678] sm:$0xff]  ;;  %v3071_v8 = vpack.c.bf16 %v4357_v34, %v4355_v22  ;;  %v3073_v42 = vpack.c.bf16 %v4364_v5, %v4362_v18  ;;  %v3077_v18 = vpack.c.bf16 %v4385_v3, %v4383_v48 }
 0x164   : > { %v1478_v23 = vadd.f32 %v1477_v54, %v1476_v38  ;;  %4755 = vst [vmem:[#allocation13_spill] sm:$0xff] %v4418_v15  ;;  %v4420_v47 = vld [vmem:[#allocation5 + $0x768] sm:$0xff]  ;;  %v4426_v38 = vld [vmem:[#allocation5 + $0x670] sm:$0xff]  ;;  %v4432_v35 = vld [vmem:[#allocation5 + $0x7f8] sm:$0xff]  ;;  %v4759_v22 = vpack.c.bf16 %v4313_v4, %v4311_v28  ;;  %v4760_v52 = vpack.c.bf16 %v4317_v25, %v4315_v55 }
 0x165   : > { %4756 = vst [vmem:[#allocation14_spill] sm:$0xff] %v4420_v47  ;;  %v4430_v41 = vld [vmem:[#allocation5 + $0x7f0] sm:$0xff]  ;;  %4758 = vst [vmem:[#allocation15_spill] sm:$0xff] %v4432_v35  ;;  %v1590_v56 = vadd.f32 %v1589_v1, %v1588_v62  ;;  %v4442_v54 = vld [vmem:[#allocation5 + $0x778] sm:$0xff] }
 0x166   : > { %4757 = vst [vmem:[#allocation16_spill] sm:$0xff] %v4430_v41  ;;  %v4440_v43 = vld [vmem:[#allocation5 + $0x770] sm:$0xff]  ;;  %v231_v37 = vld [vmem:[%s3554_s23 + $0x68] sm:$0xff]  ;;  %v1836_v1 = vsel %vm1764_vm5, %v1478_v23, %v1835_v19  ;;  %3066 = vmatpush3.bf16.msra.mxu0 %v3065_v20  ;;  %v3075_v19 = vpack.c.bf16 %v4381_v44, %v4379_v16 }
 0x167   : > { %v247_v6 = vld [vmem:[%s3554_s23 + $0xe8] sm:$0xff]  ;;  %v1837_v17 = vsel %vm1766_vm6, %v1590_v56, %v1836_v1  ;;  %3068 = vmatprep.subr.bf16.mxu0 %v3067_v36  ;;  %v3079_v36 = vpack.c.bf16 %v4402_v49, %v4400_v58  ;;  %v3117_v45 = vpack.c.bf16 %v4442_v54, %v4440_v43 }
 0x168   : > { %v263_v10 = vld [vmem:[%s3554_s23 + $0x168] sm:$0xff]  ;;  %2304 = vmatmul.mubr.f32.vlgmr.msra.gmra.mrb[4].mxu1 %v1837_v17  ;;  %v821_v53 = vadd.f32 %v247_v6, %v231_v37 }
 0x169   : > { %v279_v62 = vld [vmem:[%s3554_s23 + $0x1e8] sm:$0xff]  ;;  %3090 = vmatpush3.bf16.msra.mxu1 %v3089_v9 }
 0x16a   : > { %v295_v57 = vld [vmem:[%s3554_s23 + $0x268] sm:$0xff]  ;;  %3092 = vmatprep.subr.bf16.mxu1 %v4759_v22  ;;  %3070 = vmatpush3.bf16.msra.mxu0 %v3069_v13  ;;  %v933_v9 = vadd.f32 %v279_v62, %v263_v10  ;;  %v822_v47 = vrot.slane %v821_v53, 4  ;;  %v4761_v10 = vpack.c.bf16 %v4331_v29, %v4329_v59 }
 0x16b   : > { %v311_v26 = vld [vmem:[%s3554_s23 + $0x2e8] sm:$0xff]  ;;  %3072 = vmatprep.subr.bf16.mxu0 %v3071_v8 }
 0x16c   : > { %v327_v24 = vld [vmem:[%s3554_s23 + $0x368] sm:$0xff]  ;;  %v1045_v17 = vadd.f32 %v311_v26, %v295_v57  ;;  %v934_v49 = vrot.slane %v933_v9, 4 }
 0x16d   : > { %v343_v20 = vld [vmem:[%s3554_s23 + $0x3e8] sm:$0xff]  ;;  %3094 = vmatpush3.bf16.msra.mxu1 %v4760_v52 }
 0x16e   : > { %v359_v23 = vld [vmem:[%s3554_s23 + $0x468] sm:$0xff]  ;;  %v1157_v56 = vadd.f32 %v343_v20, %v327_v24  ;;  %v1046_v28 = vrot.slane %v1045_v17, 4  ;;  %3096 = vmatprep.subr.bf16.mxu1 %v4761_v10  ;;  %3074 = vmatpush3.bf16.msra.mxu0 %v3073_v42  ;;  %v823_v24 = vadd.f32 %v822_v47, %v821_v53  ;;  %v935_v26 = vadd.f32 %v934_v49, %v933_v9 }
 0x16f   : > { %v375_v34 = vld [vmem:[%s3554_s23 + $0x4e8] sm:$0xff]  ;;  %3076 = vmatprep.subr.bf16.mxu0 %v3075_v19  ;;  %v4762_v20 = vpack.c.bf16 %v4336_v7, %v4334_v46  ;;  %v4763_v19 = vpack.c.bf16 %v4349_v27, %v4347_v60 }
 0x170   : > { %v391_v48 = vld [vmem:[%s3554_s23 + $0x568] sm:$0xff]  ;;  %v1269_v58 = vadd.f32 %v375_v34, %v359_v23  ;;  %v1158_v4 = vrot.slane %v1157_v56, 4  ;;  %v1047_v37 = vadd.f32 %v1046_v28, %v1045_v17  ;;  %v824_v55 = vrot.slane %v823_v24, 2  ;;  %v278_v17 = vld [vmem:[%s3554_s23 + $0x1e0] sm:$0xff] }
 0x171   : > { %v407_v3 = vld [vmem:[%s3554_s23 + $0x5e8] sm:$0xff]  ;;  %v936_v25 = vrot.slane %v935_v26, 2  ;;  %3098 = vmatpush3.bf16.msra.mxu1 %v4762_v20  ;;  %v294_v28 = vld [vmem:[%s3554_s23 + $0x260] sm:$0xff]  ;;  %v4768_v20 = vpack.c.bf16 %v4372_v31, %v4370_v11 }
 0x172   : > { %v423_v1 = vld [vmem:[%s3554_s23 + $0x668] sm:$0xff]  ;;  %v1381_v15 = vadd.f32 %v407_v3, %v391_v48  ;;  %v1270_v13 = vrot.slane %v1269_v58, 4  ;;  %v1159_v6 = vadd.f32 %v1158_v4, %v1157_v56  ;;  %v1048_v59 = vrot.slane %v1047_v37, 2  ;;  %3100 = vmatprep.subr.bf16.mxu1 %v4763_v19  ;;  %3078 = vmatpush3.bf16.msra.mxu0 %v3077_v18  ;;  %v262_v18 = vld [vmem:[%s3554_s23 + $0x160] sm:$0xff] }
 0x173   : > { %v439_v44 = vld [vmem:[%s3554_s23 + $0x6e8] sm:$0xff]  ;;  %3080 = vmatprep.subr.bf16.mxu0 %v3079_v36  ;;  %v310_v4 = vld [vmem:[%s3554_s23 + $0x2e0] sm:$0xff] }
 0x174   : > { %v455_v5 = vld [vmem:[%s3554_s23 + $0x768] sm:$0xff]  ;;  %v1493_v41 = vadd.f32 %v439_v44, %v423_v1  ;;  %v1382_v22 = vrot.slane %v1381_v15, 4  ;;  %v1271_v62 = vadd.f32 %v1270_v13, %v1269_v58  ;;  %v1160_v29 = vrot.slane %v1159_v6, 2  ;;  %v230_v44 = vld [vmem:[%s3554_s23 + $0x60] sm:$0xff] }
 0x175   : > { %v471_v16 = vld [vmem:[%s3554_s23 + $0x7e8] sm:$0xff]  ;;  %v1049_v46 = vadd.f32 %v1048_v59, %v1047_v37  ;;  %v246_v1 = vld [vmem:[%s3554_s23 + $0xe0] sm:$0xff]  ;;  %v4764_v58 = vpack.c.bf16 %v4353_v2, %v4351_v61  ;;  %v4765_v13 = vpack.c.bf16 %v4368_v21, %v4366_v33  ;;  %v4767_v37 = vpack.c.bf16 %v4424_v39, %v4422_v51 }
 0x176   : > { %v1605_v35 = vadd.f32 %v471_v16, %v455_v5  ;;  %v1494_v57 = vrot.slane %v1493_v41, 4  ;;  %v1383_v34 = vadd.f32 %v1382_v22, %v1381_v15  ;;  %v1272_v47 = vrot.slane %v1271_v62, 2 }
 0x177   : > { %v825_v15 = vadd.f32 %v824_v55, %v823_v24  ;;  %v1161_v7 = vadd.f32 %v1160_v29, %v1159_v6  ;;  %3102 = vmatpush3.bf16.msra.mxu1 %v4764_v58  ;;  %v1050_v36 = vrot.slane %v1049_v46, 1  ;;  %v4766_v22 = vpack.c.bf16 %v4406_v14, %v4404_v63  ;;  %v390_v55 = vld [vmem:[%s3554_s23 + $0x560] sm:$0xff] }
 0x178   : > { %v1606_v8 = vrot.slane %v1605_v35, 4  ;;  %v1495_v52 = vadd.f32 %v1494_v57, %v1493_v41  ;;  %v1384_v42 = vrot.slane %v1383_v34, 2  ;;  %v937_v41 = vadd.f32 %v936_v25, %v935_v26  ;;  %3104 = vmatprep.subr.bf16.mxu1 %v4765_v13  ;;  %v326_v26 = vld [vmem:[%s3554_s23 + $0x360] sm:$0xff] }
 0x179   : > { %v1273_v56 = vadd.f32 %v1272_v47, %v1271_v62  ;;  %v826_v48 = vrot.slane %v825_v15, 1  ;;  %v1162_v49 = vrot.slane %v1161_v7, 1  ;;  %3082 = vmatpush3.bf16.msra.mxu0 %v4766_v22  ;;  %v342_v57 = vld [vmem:[%s3554_s23 + $0x3e0] sm:$0xff]  ;;  %v1051_v6 = vadd.f32 %v1050_v36, %v1049_v46 }
 0x17a   : > { %v1607_v5 = vadd.f32 %v1606_v8, %v1605_v35  ;;  %v1496_v35 = vrot.slane %v1495_v52, 2  ;;  %v1385_v16 = vadd.f32 %v1384_v42, %v1383_v34  ;;  %v938_v3 = vrot.slane %v937_v41, 1  ;;  %v358_v8 = vld [vmem:[%s3554_s23 + $0x460] sm:$0xff]  ;;  %3084 = vmatprep.subr.bf16.mxu0 %v4767_v37  ;;  %v4777_v37 = vld [vmem:[#allocation15_spill] sm:$0xff] }
 0x17b   : > { %v1274_v53 = vrot.slane %v1273_v56, 1  ;;  %v827_v61 = vadd.f32 %v826_v48, %v825_v15  ;;  %v1163_v33 = vadd.f32 %v1162_v49, %v1161_v7  ;;  %v374_v34 = vld [vmem:[%s3554_s23 + $0x4e0] sm:$0xff]  ;;  %3106 = vmatpush3.bf16.msra.mxu1 %v4768_v20  ;;  %v926_v39 = vadd.f32 %v278_v17, %v262_v18  ;;  %v4772_v18 = vld [vmem:[#allocation12_spill] sm:$0xff] }
 0x17c   : > { %v1608_v23 = vrot.slane %v1607_v5, 2  ;;  %v1497_v60 = vadd.f32 %v1496_v35, %v1495_v52  ;;  %v1386_v9 = vrot.slane %v1385_v16, 1  ;;  %v939_v2 = vadd.f32 %v938_v3, %v937_v41  ;;  %v406_v63 = vld [vmem:[%s3554_s23 + $0x5e0] sm:$0xff]  ;;  %v249_v20 = vld [vmem:[%s3554_s23 + $0xf8] sm:$0xff] }
 0x17d   : > { %v1275_v21 = vadd.f32 %v1274_v53, %v1273_v56  ;;  %v1038_v59 = vadd.f32 %v310_v4, %v294_v28  ;;  %v1150_v29 = vadd.f32 %v342_v57, %v326_v26  ;;  %v4769_v47 = vpack.c.bf16 %v4389_v0, %v4387_v50  ;;  %v422_v50 = vld [vmem:[%s3554_s23 + $0x660] sm:$0xff] }
 0x17e   : > { %v1609_v27 = vadd.f32 %v1608_v23, %v1607_v5  ;;  %v1498_v10 = vrot.slane %v1497_v60, 1  ;;  %v1387_v62 = vadd.f32 %v1386_v9, %v1385_v16  ;;  %v1852_v52 = vsel %vm1754_vm0, %v939_v2, %v827_v61  ;;  %v438_v0 = vld [vmem:[%s3554_s23 + $0x6e0] sm:$0xff] }
 0x17f   : > { %v814_v5 = vadd.f32 %v246_v1, %v230_v44  ;;  %v1853_v51 = vsel %vm1756_vm1, %v1051_v6, %v1852_v52  ;;  %3108 = vmatprep.subr.bf16.mxu1 %v4769_v47  ;;  %v4770_v42 = vpack.c.bf16 %v4428_v30, %v4426_v38  ;;  %v1262_v31 = vadd.f32 %v374_v34, %v358_v8  ;;  %v454_v48 = vld [vmem:[%s3554_s23 + $0x760] sm:$0xff]  ;;  %v4778_v6 = vld [vmem:[#allocation16_spill] sm:$0xff] }
 0x180   : > { %v1610_v24 = vrot.slane %v1609_v27, 1  ;;  %v1499_v14 = vadd.f32 %v1498_v10, %v1497_v60  ;;  %v1854_v19 = vsel %vm1758_vm2, %v1163_v33, %v1853_v51  ;;  %v1374_v15 = vadd.f32 %v406_v63, %v390_v55  ;;  %v470_v3 = vld [vmem:[%s3554_s23 + $0x7e0] sm:$0xff]  ;;  %v265_v51 = vld [vmem:[%s3554_s23 + $0x178] sm:$0xff] }
 0x181   : > { %3086 = vmatpush3.bf16.msra.mxu0 %v4770_v42  ;;  %v815_v11 = vrot.slane %v814_v5, 4  ;;  %v1855_v41 = vsel %vm1760_vm3, %v1275_v21, %v1854_v19  ;;  %v927_v35 = vrot.slane %v926_v39, 4  ;;  %v1039_v23 = vrot.slane %v1038_v59, 4  ;;  %v4774_v2 = vld [vmem:[#allocation14_spill] sm:$0xff]  ;;  %v4775_v10 = vld [vmem:[#allocation13_spill] sm:$0xff] }
 0x182   : > { %v1611_v25 = vadd.f32 %v1610_v24, %v1609_v27  ;;  %v1151_v46 = vrot.slane %v1150_v29, 4  ;;  %v1856_v7 = vsel %vm1762_vm4, %v1387_v62, %v1855_v41  ;;  %v1263_v16 = vrot.slane %v1262_v31, 4  ;;  %v281_v42 = vld [vmem:[%s3554_s23 + $0x1f8] sm:$0xff] }
 0x183   : > { %v816_v56 = vadd.f32 %v815_v11, %v814_v5  ;;  %v1375_v38 = vrot.slane %v1374_v15, 4  ;;  %v4771_v30 = vpack.c.bf16 %v4398_v40, %v4396_v32  ;;  %v1857_v44 = vsel %vm1764_vm5, %v1499_v14, %v1856_v7  ;;  %v233_v5 = vld [vmem:[%s3554_s23 + $0x78] sm:$0xff] }
 0x184   : > { %v928_v60 = vadd.f32 %v927_v35, %v926_v39  ;;  %v1040_v27 = vadd.f32 %v1039_v23, %v1038_v59  ;;  %v1152_v1 = vadd.f32 %v1151_v46, %v1150_v29  ;;  %v4773_v17 = vpack.c.bf16 %v4410_v12, %v4772_v18  ;;  %v297_v19 = vld [vmem:[%s3554_s23 + $0x278] sm:$0xff] }
 0x185   : > { %3110 = vmatpush3.bf16.msra.mxu1 %v4771_v30  ;;  %v1858_v58 = vsel %vm1766_vm6, %v1611_v25, %v1857_v44  ;;  %v817_v36 = vrot.slane %v816_v56, 2  ;;  %v1264_v49 = vadd.f32 %v1263_v16, %v1262_v31  ;;  %v1376_v53 = vadd.f32 %v1375_v38, %v1374_v15  ;;  %v313_v11 = vld [vmem:[%s3554_s23 + $0x2f8] sm:$0xff] }
 0x186   : > { %3112 = vmatprep.subr.bf16.mxu1 %v4773_v17  ;;  %2373 = vmatprep.mubr.f32.mxu0 %v1858_v58  ;;  %v929_v9 = vrot.slane %v928_v60, 2  ;;  %v1041_v32 = vrot.slane %v1040_v27, 2  ;;  %v1153_v40 = vrot.slane %v1152_v1, 2  ;;  %v1486_v28 = vadd.f32 %v438_v0, %v422_v50  ;;  %v329_v23 = vld [vmem:[%s3554_s23 + $0x378] sm:$0xff] }
 0x187   : > { %v818_v4 = vadd.f32 %v817_v36, %v816_v56  ;;  %v1265_v13 = vrot.slane %v1264_v49, 2  ;;  %v1377_v22 = vrot.slane %v1376_v53, 2  ;;  %v1598_v61 = vadd.f32 %v470_v3, %v454_v48  ;;  %v345_v46 = vld [vmem:[%s3554_s23 + $0x3f8] sm:$0xff] }
 0x188   : > { %v4776_v24 = vpack.c.bf16 %v4774_v2, %v4775_v10  ;;  %v930_v12 = vadd.f32 %v929_v9, %v928_v60  ;;  %v1042_v26 = vadd.f32 %v1041_v32, %v1040_v27  ;;  %v1154_v57 = vadd.f32 %v1153_v40, %v1152_v1  ;;  %v361_v27 = vld [vmem:[%s3554_s23 + $0x478] sm:$0xff] }
 0x189   : > { %v1487_v8 = vrot.slane %v1486_v28, 4  ;;  %v4779_v33 = vpack.c.bf16 %v4777_v37, %v4778_v6  ;;  %v819_v21 = vrot.slane %v818_v4, 1  ;;  %v1266_v62 = vadd.f32 %v1265_v13, %v1264_v49  ;;  %v377_v1 = vld [vmem:[%s3554_s23 + $0x4f8] sm:$0xff] }
 0x18a   : > { %3114 = vmatpush3.bf16.msra.mxu1 %v4776_v24  ;;  %v1378_v34 = vadd.f32 %v1377_v22, %v1376_v53  ;;  %v1599_v55 = vrot.slane %v1598_v61, 4  ;;  %v931_v63 = vrot.slane %v930_v12, 1  ;;  %v1043_v14 = vrot.slane %v1042_v26, 1  ;;  %v393_v49 = vld [vmem:[%s3554_s23 + $0x578] sm:$0xff] }
 0x18b   : > { %3116 = vmatprep.subr.bf16.mxu1 %v4779_v33  ;;  %v1155_v25 = vrot.slane %v1154_v57, 1  ;;  %v1488_v52 = vadd.f32 %v1487_v8, %v1486_v28  ;;  %v820_v39 = vadd.f32 %v819_v21, %v818_v4  ;;  %v1267_v59 = vrot.slane %v1266_v62, 1  ;;  %v409_v53 = vld [vmem:[%s3554_s23 + $0x5f8] sm:$0xff] }
 0x18c   : > { %v1379_v29 = vrot.slane %v1378_v34, 1  ;;  %v1600_v47 = vadd.f32 %v1599_v55, %v1598_v61  ;;  %v932_v31 = vadd.f32 %v931_v63, %v930_v12  ;;  %v1044_v15 = vadd.f32 %v1043_v14, %v1042_v26  ;;  %v425_v61 = vld [vmem:[%s3554_s23 + $0x678] sm:$0xff] }
 0x18d   : > { %v1156_v41 = vadd.f32 %v1155_v25, %v1154_v57  ;;  %v1489_v35 = vrot.slane %v1488_v52, 2  ;;  %v1268_v7 = vadd.f32 %v1267_v59, %v1266_v62  ;;  %v835_v56 = vadd.f32 %v249_v20, %v233_v5  ;;  %v441_v2 = vld [vmem:[%s3554_s23 + $0x6f8] sm:$0xff] }
 0x18e   : > { %3118 = vmatpush3.bf16.msra.mxu1 %v3117_v45  ;;  %v1380_v50 = vadd.f32 %v1379_v29, %v1378_v34  ;;  %v1601_v0 = vrot.slane %v1600_v47, 2  ;;  %v1845_v38 = vsel %vm1754_vm0, %v932_v31, %v820_v39  ;;  %v947_v30 = vadd.f32 %v281_v42, %v265_v51  ;;  %v457_v57 = vld [vmem:[%s3554_s23 + $0x778] sm:$0xff] }
 0x18f   : > { %v1490_v16 = vadd.f32 %v1489_v35, %v1488_v52  ;;  %v1059_v43 = vadd.f32 %v313_v11, %v297_v19  ;;  %v1846_v45 = vsel %vm1756_vm1, %v1044_v15, %v1845_v38  ;;  %v836_v44 = vrot.slane %v835_v56, 4  ;;  %v473_v8 = vld [vmem:[%s3554_s23 + $0x7f8] sm:$0xff]  ;;  %v232_v19 = vld [vmem:[%s3554_s23 + $0x70] sm:$0xff] }
 0x190   : > { %v1602_v54 = vadd.f32 %v1601_v0, %v1600_v47  ;;  %v1171_v48 = vadd.f32 %v345_v46, %v329_v23  ;;  %v1847_v60 = vsel %vm1758_vm2, %v1156_v41, %v1846_v45  ;;  %v948_v18 = vrot.slane %v947_v30, 4  ;;  %v248_v11 = vld [vmem:[%s3554_s23 + $0xf0] sm:$0xff] }
 0x191   : > { %v1491_v3 = vrot.slane %v1490_v16, 1  ;;  %v1060_v17 = vrot.slane %v1059_v43, 4  ;;  %v1848_v36 = vsel %vm1760_vm3, %v1268_v7, %v1847_v60  ;;  %v837_v9 = vadd.f32 %v836_v44, %v835_v56  ;;  %v264_v23 = vld [vmem:[%s3554_s23 + $0x170] sm:$0xff] }
 0x192   : > { %v1603_v58 = vrot.slane %v1602_v54, 1  ;;  %v1172_v32 = vrot.slane %v1171_v48, 4  ;;  %v1849_v28 = vsel %vm1762_vm4, %v1380_v50, %v1848_v36  ;;  %v949_v4 = vadd.f32 %v948_v18, %v947_v30  ;;  %v280_v46 = vld [vmem:[%s3554_s23 + $0x1f0] sm:$0xff] }
 0x193   : > { %v1492_v40 = vadd.f32 %v1491_v3, %v1490_v16  ;;  %v1061_v13 = vadd.f32 %v1060_v17, %v1059_v43  ;;  %v838_v10 = vrot.slane %v837_v9, 2  ;;  %v1283_v12 = vadd.f32 %v377_v1, %v361_v27  ;;  %v312_v3 = vld [vmem:[%s3554_s23 + $0x2f0] sm:$0xff] }
 0x194   : > { %v1604_v22 = vadd.f32 %v1603_v58, %v1602_v54  ;;  %v1173_v24 = vadd.f32 %v1172_v32, %v1171_v48  ;;  %v950_v37 = vrot.slane %v949_v4, 2  ;;  %v1395_v33 = vadd.f32 %v409_v53, %v393_v49  ;;  %v296_v48 = vld [vmem:[%s3554_s23 + $0x270] sm:$0xff] }
 0x195   : > { %v1850_v26 = vsel %vm1764_vm5, %v1492_v40, %v1849_v28  ;;  %v1062_v6 = vrot.slane %v1061_v13, 2  ;;  %v839_v62 = vadd.f32 %v838_v10, %v837_v9  ;;  %v1284_v55 = vrot.slane %v1283_v12, 4  ;;  %v328_v17 = vld [vmem:[%s3554_s23 + $0x370] sm:$0xff] }
 0x196   : > { %v1851_v21 = vsel %vm1766_vm6, %v1604_v22, %v1850_v26  ;;  %v1174_v34 = vrot.slane %v1173_v24, 2  ;;  %v951_v63 = vadd.f32 %v950_v37, %v949_v4  ;;  %v1396_v25 = vrot.slane %v1395_v33, 4  ;;  %v344_v58 = vld [vmem:[%s3554_s23 + $0x3f0] sm:$0xff] }
 0x197   : > { %2374 = vmatmul.mubr.f32.vlgmr.msra.gmra.mrb[6].mxu0 %v1851_v21  ;;  %v1063_v14 = vadd.f32 %v1062_v6, %v1061_v13  ;;  %v1507_v52 = vadd.f32 %v441_v2, %v425_v61  ;;  %v840_v5 = vrot.slane %v839_v62, 1  ;;  %v1285_v51 = vadd.f32 %v1284_v55, %v1283_v12  ;;  %v360_v2 = vld [vmem:[%s3554_s23 + $0x470] sm:$0xff] }
 0x198   : > { %v1175_v20 = vadd.f32 %v1174_v34, %v1173_v24  ;;  %v1619_v39 = vadd.f32 %v473_v8, %v457_v57  ;;  %v952_v59 = vrot.slane %v951_v63, 1  ;;  %v1397_v47 = vadd.f32 %v1396_v25, %v1395_v33  ;;  %v376_v10 = vld [vmem:[%s3554_s23 + $0x4f0] sm:$0xff] }
 0x199   : > { %v1064_v29 = vrot.slane %v1063_v14, 1  ;;  %v1508_v42 = vrot.slane %v1507_v52, 4  ;;  %v841_v31 = vadd.f32 %v840_v5, %v839_v62  ;;  %v1286_v41 = vrot.slane %v1285_v51, 2  ;;  %v392_v8 = vld [vmem:[%s3554_s23 + $0x570] sm:$0xff] }
 0x19a   : > { %v1176_v15 = vrot.slane %v1175_v20, 1  ;;  %v1620_v35 = vrot.slane %v1619_v39, 4  ;;  %v953_v7 = vadd.f32 %v952_v59, %v951_v63  ;;  %v1398_v0 = vrot.slane %v1397_v47, 2  ;;  %v408_v37 = vld [vmem:[%s3554_s23 + $0x5f0] sm:$0xff]  ;;  %v2615_v63 = vpop.f32.mrb[0].mxu0 }
 0x19b   : > { %v1065_v50 = vadd.f32 %v1064_v29, %v1063_v14  ;;  %v1509_v56 = vadd.f32 %v1508_v42, %v1507_v52  ;;  %v1287_v38 = vadd.f32 %v1286_v41, %v1285_v51  ;;  %v828_v43 = vadd.f32 %v248_v11, %v232_v19  ;;  %v424_v25 = vld [vmem:[%s3554_s23 + $0x670] sm:$0xff] }
 0x19c   : > { %v1177_v16 = vadd.f32 %v1176_v15, %v1175_v20  ;;  %v1621_v30 = vadd.f32 %v1620_v35, %v1619_v39  ;;  %v1399_v54 = vadd.f32 %v1398_v0, %v1397_v47  ;;  %v1866_v44 = vsel %vm1754_vm0, %v953_v7, %v841_v31  ;;  %v440_v52 = vld [vmem:[%s3554_s23 + $0x6f0] sm:$0xff]  ;;  %v2616_v39 = vpop.f32.mrb[1].mxu0 }
 0x19d   : > { %v1510_v45 = vrot.slane %v1509_v56, 2  ;;  %v940_v60 = vadd.f32 %v280_v46, %v264_v23  ;;  %v1288_v27 = vrot.slane %v1287_v38, 1  ;;  %v1867_v18 = vsel %vm1756_vm1, %v1065_v50, %v1866_v44  ;;  %v456_v29 = vld [vmem:[%s3554_s23 + $0x770] sm:$0xff] }
 0x19e   : > { %v1622_v1 = vrot.slane %v1621_v30, 2  ;;  %v829_v36 = vrot.slane %v828_v43, 4  ;;  %v1400_v49 = vrot.slane %v1399_v54, 1  ;;  %v1868_v9 = vsel %vm1758_vm2, %v1177_v16, %v1867_v18  ;;  %v472_v47 = vld [vmem:[%s3554_s23 + $0x7f0] sm:$0xff] }
 0x19f   : > { %v1511_v53 = vadd.f32 %v1510_v45, %v1509_v56  ;;  %v941_v32 = vrot.slane %v940_v60, 4  ;;  %v1289_v40 = vadd.f32 %v1288_v27, %v1287_v38  ;;  %v1052_v13 = vadd.f32 %v312_v3, %v296_v48 }
 0x1a0   : > { %v1623_v28 = vadd.f32 %v1622_v1, %v1621_v30  ;;  %v830_v4 = vadd.f32 %v829_v36, %v828_v43  ;;  %v1401_v22 = vadd.f32 %v1400_v49, %v1399_v54  ;;  %v1164_v12 = vadd.f32 %v344_v58, %v328_v17 }
 0x1a1   : > { %v1512_v61 = vrot.slane %v1511_v53, 1  ;;  %v942_v24 = vadd.f32 %v941_v32, %v940_v60  ;;  %v1869_v57 = vsel %vm1760_vm3, %v1289_v40, %v1868_v9  ;;  %v1053_v33 = vrot.slane %v1052_v13, 4 }
 0x1a2   : > { %v1624_v26 = vrot.slane %v1623_v28, 1  ;;  %v831_v6 = vrot.slane %v830_v4, 2  ;;  %v1870_v62 = vsel %vm1762_vm4, %v1401_v22, %v1869_v57  ;;  %v1165_v55 = vrot.slane %v1164_v12, 4 }
 0x1a3   : > { %v1513_v21 = vadd.f32 %v1512_v61, %v1511_v53  ;;  %v943_v34 = vrot.slane %v942_v24, 2  ;;  %v1054_v20 = vadd.f32 %v1053_v33, %v1052_v13  ;;  %v1276_v51 = vadd.f32 %v376_v10, %v360_v2 }
 0x1a4   : > { %v1625_v14 = vadd.f32 %v1624_v26, %v1623_v28  ;;  %v832_v5 = vadd.f32 %v831_v6, %v830_v4  ;;  %v1166_v19 = vadd.f32 %v1165_v55, %v1164_v12  ;;  %v1388_v11 = vadd.f32 %v408_v37, %v392_v8  ;;  %v2650_v6 = vpop.f32.mrb[0].mxu1 }
 0x1a5   : > { %v1871_v59 = vsel %vm1764_vm5, %v1513_v21, %v1870_v62  ;;  %v944_v42 = vadd.f32 %v943_v34, %v942_v24  ;;  %v1055_v41 = vrot.slane %v1054_v20, 2  ;;  %v1277_v35 = vrot.slane %v1276_v51, 4  ;;  %v2651_v21 = vpop.f32.mrb[1].mxu1 }
 0x1a6   : > { %v1872_v31 = vsel %vm1766_vm6, %v1625_v14, %v1871_v59  ;;  %v833_v15 = vrot.slane %v832_v5, 1  ;;  %v1167_v46 = vrot.slane %v1166_v19, 2  ;;  %v1389_v7 = vrot.slane %v1388_v11, 4 }
 0x1a7   : > { %2443 = vmatprep.mubr.f32.mxu1 %v1872_v31  ;;  %v945_v23 = vrot.slane %v944_v42, 1  ;;  %v1500_v50 = vadd.f32 %v440_v52, %v424_v25  ;;  %v1056_v56 = vadd.f32 %v1055_v41, %v1054_v20  ;;  %v1278_v16 = vadd.f32 %v1277_v35, %v1276_v51 }
 0x1a8   : > { %v834_v0 = vadd.f32 %v833_v15, %v832_v5  ;;  %v1612_v38 = vadd.f32 %v472_v47, %v456_v29  ;;  %v1168_v43 = vadd.f32 %v1167_v46, %v1166_v19  ;;  %v1390_v54 = vadd.f32 %v1389_v7, %v1388_v11 }
 0x1a9   : > { %v946_v30 = vadd.f32 %v945_v23, %v944_v42  ;;  %v1501_v45 = vrot.slane %v1500_v50, 4  ;;  %v1057_v44 = vrot.slane %v1056_v56, 1  ;;  %v1279_v48 = vrot.slane %v1278_v16, 2 }
 0x1aa   : > { %v1613_v3 = vrot.slane %v1612_v38, 4  ;;  %v2617_v60 = vadd.f32 %v2616_v39, %v2615_v63  ;;  %v1169_v27 = vrot.slane %v1168_v43, 1  ;;  %v1391_v1 = vrot.slane %v1390_v54, 2 }
 0x1ab   : > { %v1502_v18 = vadd.f32 %v1501_v45, %v1500_v50  ;;  %v1859_v17 = vsel %vm1754_vm0, %v946_v30, %v834_v0  ;;  %v1058_v58 = vadd.f32 %v1057_v44, %v1056_v56  ;;  %v1280_v36 = vadd.f32 %v1279_v48, %v1278_v16 }
 0x1ac   : > { %v1614_v49 = vadd.f32 %v1613_v3, %v1612_v38  ;;  %v1170_v53 = vadd.f32 %v1169_v27, %v1168_v43  ;;  %v1392_v9 = vadd.f32 %v1391_v1, %v1390_v54  ;;  %v2652_v34 = vadd.f32 %v2651_v21, %v2650_v6  ;;  %v2576_v38 = vld [vmem:[#allocation7] ss:$0 sm:$0xff] }
 0x1ad   : > { %v1503_v32 = vrot.slane %v1502_v18, 2  ;;  %v1281_v40 = vrot.slane %v1280_v36, 1  ;;  %v1860_v4 = vsel %vm1756_vm1, %v1058_v58, %v1859_v17 }
 0x1ae   : > { %v1615_v28 = vrot.slane %v1614_v49, 2  ;;  %v1393_v13 = vrot.slane %v1392_v9, 1  ;;  %v1861_v61 = vsel %vm1758_vm2, %v1170_v53, %v1860_v4  ;;  %v2026_v63 = vadd.f32 %v2652_v34, %v2617_v60 }
 0x1af   : > { %v1504_v22 = vadd.f32 %v1503_v32, %v1502_v18  ;;  %v1282_v2 = vadd.f32 %v1281_v40, %v1280_v36 }
 0x1b0   : > { %v1616_v10 = vadd.f32 %v1615_v28, %v1614_v49  ;;  %v1394_v24 = vadd.f32 %v1393_v13, %v1392_v9 }
 0x1b1   : > { %v1505_v12 = vrot.slane %v1504_v22, 1  ;;  %v1862_v57 = vsel %vm1760_vm3, %v1282_v2, %v1861_v61 }
 0x1b2   : > { %v1617_v26 = vrot.slane %v1616_v10, 1  ;;  %v1863_v37 = vsel %vm1762_vm4, %v1394_v24, %v1862_v57 }
 0x1b3   : > { %v1506_v8 = vadd.f32 %v1505_v12, %v1504_v22 }
 0x1b4   : > { %v1618_v33 = vadd.f32 %v1617_v26, %v1616_v10 }
 0x1b5   : > { %v1864_v62 = vsel %vm1764_vm5, %v1506_v8, %v1863_v37 }
 0x1b6   : > { %v1865_v55 = vsel %vm1766_vm6, %v1618_v33, %v1864_v62 }
 0x1b7   : > { %2444 = vmatmul.mubr.f32.vlgmr.msra.gmra.mrb[6].mxu1 %v1865_v55 }
 0x1ce   : > { %v2685_v14 = vpop.f32.mrb[2].mxu0 }
 0x1cf   : > { %v2686_v25 = vpop.f32.mrb[3].mxu0 }
 0x1d0   : > { %v2687_v52 = vadd.f32 %v2686_v25, %v2685_v14 }
 0x1d2   : > { %v2096_v5 = vadd.f32 %v2687_v52, %v2026_v63 }
 0x1ee   : > { %v2720_v20 = vpop.f32.mrb[2].mxu1 }
 0x1ef   : > { %v2721_v51 = vpop.f32.mrb[3].mxu1 }
 0x1f0   : > { %v2722_v39 = vadd.f32 %v2721_v51, %v2720_v20 }
 0x1f2   : > { %v2166_v59 = vadd.f32 %v2722_v39, %v2096_v5 }
 0x21b   : > { %v2755_v29 = vpop.f32.mrb[4].mxu0 }
 0x21c   : > { %v2756_v47 = vpop.f32.mrb[5].mxu0 }
 0x21d   : > { %v2757_v42 = vadd.f32 %v2756_v47, %v2755_v29 }
 0x21f   : > { %v2236_v19 = vadd.f32 %v2757_v42, %v2166_v59 }
 0x23b   : > { %v2790_v11 = vpop.f32.mrb[4].mxu1 }
 0x23c   : > { %v2791_v31 = vpop.f32.mrb[5].mxu1 }
 0x23d   : > { %v2792_v15 = vadd.f32 %v2791_v31, %v2790_v11 }
 0x23f   : > { %v2306_v41 = vadd.f32 %v2792_v15, %v2236_v19 }
 0x26a   : > { %v2825_v35 = vpop.f32.mrb[6].mxu0 }
 0x26b   : > { %v2826_v23 = vpop.f32.mrb[7].mxu0 }
 0x26c   : > { %v2827_v46 = vadd.f32 %v2826_v23, %v2825_v35 }
 0x26e   : > { %v2376_v7 = vadd.f32 %v2827_v46, %v2306_v41 }
 0x28a   : > { %v2860_v50 = vpop.f32.mrb[6].mxu1 }
 0x28b   : > { %v2861_v0 = vpop.f32.mrb[7].mxu1 }
 0x28c   : > { %v2862_v56 = vadd.f32 %v2861_v0, %v2860_v50 }
 0x28e   : > { %v2446_v16 = vadd.f32 %v2862_v56, %v2376_v7 }
 0x290   : > { %v2449_v30 = vmul.f32 0.0625, %v2446_v16 }
 0x292   : > { %v2457_v43 = vadd.f32 %v2576_v38, %v2449_v30 }
 0x294   : > { %2458 = vst [vmem:[%s216_s7] sm:$0xff] %v2457_v43 }
 0x295   : > { %3288 = shalt.err (!%p3285_p1)
}
 0x296   : > { %s3289_s17 = scalar_lea.hbm %s4627_s22, 128  ;;  %s3293_s29 = scalar_lea.hbm %s4674_s3, 256 }
 0x297   : > { %p3290_p13 = scmp.ne.s32.totalorder %s4627_s22, %s3289_s17  ;;  %p3294_p4 = scmp.lt.u32.totalorder %s4627_s22, %s4674_s3 }
 0x298   : > { %p3295_p5 = scmp.lt.u32.totalorder %s3293_s29, %s3289_s17  ;;  %p3297_p11 = scmp.lt.u32.totalorder %s3289_s17, %s4627_s22 }
 0x299   : > { %p3291_p6 = pnand %p3290_p13, %p4780_p0 }
 0x29a   : > { %p3296_p8 = por %p3295_p5, %p3294_p4 }
 0x29b   : > { %p3292_p10 = pneg %p3291_p6 }
 0x29c   : > { %p3298_p2 = por %p3297_p11, %p3296_p8 }
 0x29e   : > { %p3299_p3 = pnand %p3298_p2, %p3292_p10 }
 0x2a0   : > { %3302 = shalt.err (!%p3299_p3)
}
 0x2a1   : > { %3129 = dma.vmem_to_hbm [thread:$0]  (%p4780_p0), %s4629_s24, 128, %s4627_s22, %s2460_s6  }
 0x2a2 PF: > { %s2485_s23 = sand.u32 1, %s3333_s12   ;;  %p4781_p7 = scmp.ne.s32.totalorder %s4693_s19, 0 }
 0x2a3   : > { %p4782_p9 = scmp.ge.s32.totalorder %s3345_s15, 2  ;;  %s2486_s18 = scalar_lea.sflag [#allocation4], %s2485_s23 }
 0x2a5   : > { %p3143_p12 = pnand %p4782_p9, %p4781_p7 }
 0x2a7   : > { %3328 = dma.done.wait (!%p3143_p12), %s2486_s18, 128  }
 0x2a8   : > { %3330 = vsyncadd (!%p3143_p12), %s2486_s18, 4294967168  ;;  %p17_p1 = scmp.ge.s32.totalorder %s3487_s5, 4   ;;  %s4783_s12 = smov %s3337_s13 }
 0x2a9   : > { %s4784_s13 = smov %s3341_s14  ;;  %s4785_s14 = smov %s3503_s9 }
 0x2aa   : > { %s4786_s15 = smov %s3487_s5  ;;  %19 = sbr.rel (!%p17_p1) target bundleno = 6 (0x6), region = 85 }
 0x2b1   :  { %2491 = vsyncpa [#allocation3], 1 }
 0x2b2   :  { %2493 = vsyncpa [#allocation3 + $0x1], 1 }
 0x2b3   :  { %2494 = vsyncpa [#allocation6], 1 }
 0x2b4   :  { %2495 = vsyncpa [#allocation4], 1 }
 0x2b5   :  { %2497 = vsyncpa [#allocation4 + $0x1], 1 }

</bundles_post_ra>
